<compile_context>
chip_gen: v7x
topology: tpu7x:2x2x1
jax: 0.10.0
libtpu: 0.0.40
codegen_flags: <defaults>
</compile_context>

<pallas_src>
import jax
import jax.numpy as jnp
from jax.experimental import pallas as pl
from jax.experimental.pallas import tpu as pltpu


def _sigmoid_mul_kernel(gate_ref, x_ref, o_ref):
    # gate_ref: (rows, 1), x_ref: (rows, HW).  Compute in f32, store native.
    g = jax.nn.sigmoid(gate_ref[...].astype(jnp.float32))
    o_ref[...] = (g * x_ref[...].astype(jnp.float32)).astype(o_ref.dtype)


def sigmoid_mul(gate_nchw, x_nchw, *, vmem_budget_bytes=24 * 1024 * 1024):
    """gate_nchw: (N, C, 1, 1), x_nchw: (N, C, H, W) -> (N, C, H, W)."""
    N, C, H, W = x_nchw.shape
    assert gate_nchw.shape == (N, C, 1, 1)
    NC, HW = N * C, H * W
    dtype = x_nchw.dtype
    itemsize = jnp.dtype(dtype).itemsize

    # Pure metadata reshapes (contiguous dims collapse), no data movement.
    gate2d = gate_nchw.reshape(NC, 1)
    x2d = x_nchw.reshape(NC, HW)

    total_bytes = (2 * NC * HW + NC) * itemsize  # x in + out + gate

    if total_bytes <= vmem_budget_bytes:
        # Hot path: single invocation, whole arrays resident in VMEM.
        out2d = pl.pallas_call(
            _sigmoid_mul_kernel,
            out_shape=jax.ShapeDtypeStruct((NC, HW), dtype),
            in_specs=[
                pl.BlockSpec(memory_space=pltpu.MemorySpace.VMEM),
                pl.BlockSpec(memory_space=pltpu.MemorySpace.VMEM),
            ],
            out_specs=pl.BlockSpec(memory_space=pltpu.MemorySpace.VMEM),
        )(gate2d, x2d)
    else:
        # Fallback for shapes that don't fit VMEM: tile over rows with the
        # largest sublane-aligned tile that keeps double-buffered in+out
        # comfortably under the budget.
        bytes_per_row = 2 * HW * itemsize          # x tile + out tile per row
        max_rows = vmem_budget_bytes // (4 * bytes_per_row)  # 2x double-buffer
        tc = max(8, (max_rows // 8) * 8)
        tc = min(tc, NC)
        grid = (pl.cdiv(NC, tc),)
        out2d = pl.pallas_call(
            _sigmoid_mul_kernel,
            out_shape=jax.ShapeDtypeStruct((NC, HW), dtype),
            grid_spec=pltpu.PrefetchScalarGridSpec(
                num_scalar_prefetch=0,
                grid=grid,
                in_specs=[
                    pl.BlockSpec((tc, 1), lambda i: (i, 0)),
                    pl.BlockSpec((tc, HW), lambda i: (i, 0)),
                ],
                out_specs=pl.BlockSpec((tc, HW), lambda i: (i, 0)),
            ),
            compiler_params=pltpu.CompilerParams(
                dimension_semantics=("parallel",),
            ),
        )(gate2d, x2d)

    return out2d.reshape(N, C, H, W)


if __name__ == "__main__":
    key = jax.random.PRNGKey(0)
    k1, k2 = jax.random.split(key)
    # Shapes from the module: x295: (1, 1392, 7, 7), x299: (1, 1392, 1, 1)
    x295 = jax.random.normal(k1, (1, 1392, 7, 7), dtype=jnp.float32)
    x299 = jax.random.normal(k2, (1, 1392, 1, 1), dtype=jnp.float32)

    out = sigmoid_mul(x299, x295)
    jax.block_until_ready(out)

    # Reference check in plain JAX
    ref = jax.nn.sigmoid(x299) * x295
    assert out.shape == (1, 1392, 7, 7)
    assert out.dtype == x295.dtype
    assert jnp.allclose(out, ref, atol=1e-6, rtol=1e-6)

    print("KERNEL_OK")
</pallas_src>

<mosaic_0001>
module attributes {stable_mosaic.version = 11 : i64} {
  func.func @_sigmoid_mul_kernel(%arg0: memref<1392x1xf32, #tpu.memory_space<vmem>>, %arg1: memref<1392x49xf32, #tpu.memory_space<vmem>>, %arg2: memref<1392x49xf32, #tpu.memory_space<vmem>>) attributes {dimension_semantics = [], scalar_prefetch = 0 : i64, scratch_operands = 0 : i64, tpu.core_type = #tpu.core_type<tc>} {
    %c0 = arith.constant 0 : index
    %c0_0 = arith.constant 0 : index
    %0 = vector.load %arg0[%c0, %c0_0] : memref<1392x1xf32, #tpu.memory_space<vmem>>, vector<1392x1xf32>
    %1 = arith.negf %0 : vector<1392x1xf32>
    %2 = math.exp %1 : vector<1392x1xf32>
    %cst = arith.constant 1.000000e+00 : f32
    %3 = vector.broadcast %cst : f32 to vector<1392x1xf32>
    %4 = arith.addf %3, %2 : vector<1392x1xf32>
    %5 = arith.divf %3, %4 : vector<1392x1xf32>
    %c0_1 = arith.constant 0 : index
    %c0_2 = arith.constant 0 : index
    %6 = vector.load %arg1[%c0_1, %c0_2] : memref<1392x49xf32, #tpu.memory_space<vmem>>, vector<1392x49xf32>
    %7 = vector.broadcast %5 : vector<1392x1xf32> to vector<1392x49xf32>
    %8 = arith.mulf %7, %6 : vector<1392x49xf32>
    %c0_3 = arith.constant 0 : index
    %c0_4 = arith.constant 0 : index
    %9 = vector.load %arg2[%c0_3, %c0_4] : memref<1392x49xf32, #tpu.memory_space<vmem>>, vector<1392x49xf32>
    tpu.vector_store %arg2[%c0_3, %c0_4], %8 {strides = array<i32>} : memref<1392x49xf32, #tpu.memory_space<vmem>>, vector<1392x49xf32>,
    return
  }
}

</mosaic_0001>

<bundles_post_ra>
// kernel: tpu_custom_call.1
= control target key start
LH: loop header
LB: loop body
LE: loop exit
PB: predicated region body
PF: predicated region fallthrough
CT: control target
= control target key end

     0   :  { %v3499_v0 = vmov 0   ;;  %vm2447_vm0 = vcmask 400384   ;;  %s5297_s0 = inlined_call_operand.vmem [shape: f32[1392,1], index: 0, kind: input, shape index: {}]   ;;  %s5298_s1 = inlined_call_operand.vmem [shape: f32[1392,49], index: 1, kind: input, shape index: {}]   ;;  %s5299_s2 = inlined_call_operand.vmem [shape: f32[1392,49], index: 2, kind: output, shape index: {}]  }
   0x1   :  { %2802 = vset.pattern.permute.xlu1 %v3499_v0  ;;  %2801 = vset.pattern.permute.xlu0 %v3499_v0  ;;  %v13_v1 = vld [vmem:[%s5297_s0 + $0x10] sm:$0xff]  ;;  %v11_v2 = vld [vmem:[%s5297_s0] sm:$0xff]  ;;  %v14_v3 = vld [vmem:[%s5297_s0 + $0x18] sm:$0xff] }
   0x2   :  { %v2628_v4 = vmul.f32 -1.442695, %v13_v1  ;;  %v2626_v5 = vmul.f32 -1.442695, %v11_v2  ;;  %v2629_v6 = vmul.f32 -1.442695, %v14_v3 }
   0x3   :  { %v12_v7 = vld [vmem:[%s5297_s0 + $0x8] sm:$0xff]  ;;  %v15_v9 = vld [vmem:[%s5297_s0 + $0x20] sm:$0xff]  ;;  %v18_v13 = vld [vmem:[%s5297_s0 + $0x38] sm:$0xff] }
   0x4   :  { %v16_v8 = vld [vmem:[%s5297_s0 + $0x28] sm:$0xff]  ;;  %2803 = vpow2.f32 %v2628_v4  ;;  %v2627_v10 = vmul.f32 -1.442695, %v12_v7  ;;  %v2630_v12 = vmul.f32 -1.442695, %v15_v9  ;;  %v17_v14 = vld [vmem:[%s5297_s0 + $0x30] sm:$0xff] }
   0x5   :  { %v2631_v11 = vmul.f32 -1.442695, %v16_v8  ;;  %2805 = vpow2.f32 %v2626_v5  ;;  %v20_v15 = vld [vmem:[%s5297_s0 + $0x48] sm:$0xff]  ;;  %v2633_v16 = vmul.f32 -1.442695, %v18_v13  ;;  %v19_v18 = vld [vmem:[%s5297_s0 + $0x40] sm:$0xff] }
   0x6   :  { %2807 = vpow2.f32 %v2629_v6  ;;  %v2632_v17 = vmul.f32 -1.442695, %v17_v14  ;;  %v22_v19 = vld [vmem:[%s5297_s0 + $0x58] sm:$0xff]  ;;  %v2635_v20 = vmul.f32 -1.442695, %v20_v15  ;;  %v21_v21 = vld [vmem:[%s5297_s0 + $0x50] sm:$0xff] }
   0x7   :  { %2809 = vpow2.f32 %v2627_v10  ;;  %v2634_v22 = vmul.f32 -1.442695, %v19_v18  ;;  %v24_v23 = vld [vmem:[%s5297_s0 + $0x68] sm:$0xff]  ;;  %v2637_v24 = vmul.f32 -1.442695, %v22_v19  ;;  %v23_v46 = vld [vmem:[%s5297_s0 + $0x60] sm:$0xff] }
   0x8   :  { %2811 = vpow2.f32 %v2631_v11  ;;  %v2636_v25 = vmul.f32 -1.442695, %v21_v21  ;;  %v2639_v26 = vmul.f32 -1.442695, %v24_v23  ;;  %v26_v49 = vld [vmem:[%s5297_s0 + $0x78] sm:$0xff]  ;;  %v25_v52 = vld [vmem:[%s5297_s0 + $0x70] sm:$0xff] }
   0x9   :  { %2813 = vpow2.f32 %v2630_v12  ;;  %v2638_v55 = vmul.f32 -1.442695, %v23_v46  ;;  %v28_v56 = vld [vmem:[%s5297_s0 + $0x88] sm:$0xff]  ;;  %v2641_v59 = vmul.f32 -1.442695, %v26_v49  ;;  %v27_v60 = vld [vmem:[%s5297_s0 + $0x80] sm:$0xff] }
   0xa   :  { %2815 = vpow2.f32 %v2633_v16  ;;  %v2640_v62 = vmul.f32 -1.442695, %v25_v52  ;;  %v30_v63 = vld [vmem:[%s5297_s0 + $0x98] sm:$0xff]  ;;  %v2643_v1 = vmul.f32 -1.442695, %v28_v56  ;;  %v29_v2 = vld [vmem:[%s5297_s0 + $0x90] sm:$0xff] }
   0xb   :  { %2817 = vpow2.f32 %v2632_v17  ;;  %v2642_v4 = vmul.f32 -1.442695, %v27_v60  ;;  %v32_v5 = vld [vmem:[%s5297_s0 + $0xa8] sm:$0xff]  ;;  %v2645_v7 = vmul.f32 -1.442695, %v30_v63  ;;  %v31_v8 = vld [vmem:[%s5297_s0 + $0xa0] sm:$0xff] }
   0xc   :  { %2819 = vpow2.f32 %v2635_v20  ;;  %v2644_v10 = vmul.f32 -1.442695, %v29_v2  ;;  %v34_v11 = vld [vmem:[%s5297_s0 + $0xb8] sm:$0xff]  ;;  %v2647_v13 = vmul.f32 -1.442695, %v32_v5  ;;  %v33_v14 = vld [vmem:[%s5297_s0 + $0xb0] sm:$0xff] }
   0xd   :  { %2821 = vpow2.f32 %v2634_v22  ;;  %v2646_v16 = vmul.f32 -1.442695, %v31_v8  ;;  %v36_v17 = vld [vmem:[%s5297_s0 + $0xc8] sm:$0xff]  ;;  %v2649_v19 = vmul.f32 -1.442695, %v34_v11  ;;  %v35_v20 = vld [vmem:[%s5297_s0 + $0xc0] sm:$0xff] }
   0xe   :  { %v2804_v27 = vpop.eup %2803  ;;  %2823 = vpow2.f32 %v2637_v24  ;;  %v2648_v22 = vmul.f32 -1.442695, %v33_v14  ;;  %v2651_v24 = vmul.f32 -1.442695, %v36_v17 }
   0xf   :  { %v2806_v28 = vpop.eup %2805  ;;  %v709_v29 = vadd.f32 1.0, %v2804_v27  ;;  %2825 = vpow2.f32 %v2636_v25 }
  0x10   :  { %v2808_v30 = vpop.eup %2807  ;;  %v707_v31 = vadd.f32 1.0, %v2806_v28  ;;  %2827 = vpow2.f32 %v2639_v26  ;;  %v2650_v26 = vmul.f32 -1.442695, %v35_v20 }
  0x11   :  { %v2810_v32 = vpop.eup %2809  ;;  %2829 = vrcp.f32 %v709_v29  ;;  %v710_v33 = vadd.f32 1.0, %v2808_v30 }
  0x12   :  { %v2812_v34 = vpop.eup %2811  ;;  %2831 = vrcp.f32 %v707_v31  ;;  %v708_v35 = vadd.f32 1.0, %v2810_v32 }
  0x13   :  { %v2814_v36 = vpop.eup %2813  ;;  %2833 = vrcp.f32 %v710_v33  ;;  %v712_v37 = vadd.f32 1.0, %v2812_v34 }
  0x14   :  { %v2816_v38 = vpop.eup %2815  ;;  %2835 = vrcp.f32 %v708_v35  ;;  %v711_v39 = vadd.f32 1.0, %v2814_v36 }
  0x15   :  { %v2818_v40 = vpop.eup %2817  ;;  %2837 = vrcp.f32 %v712_v37  ;;  %v714_v41 = vadd.f32 1.0, %v2816_v38 }
  0x16   :  { %v2820_v42 = vpop.eup %2819  ;;  %2839 = vrcp.f32 %v711_v39  ;;  %v713_v43 = vadd.f32 1.0, %v2818_v40 }
  0x17   :  { %v2822_v44 = vpop.eup %2821  ;;  %2841 = vrcp.f32 %v714_v41  ;;  %v716_v45 = vadd.f32 1.0, %v2820_v42 }
  0x18   :  { %v2824_v47 = vpop.eup %2823  ;;  %2843 = vrcp.f32 %v713_v43  ;;  %v715_v48 = vadd.f32 1.0, %v2822_v44 }
  0x19   :  { %v2826_v50 = vpop.eup %2825  ;;  %2845 = vrcp.f32 %v716_v45  ;;  %v718_v51 = vadd.f32 1.0, %v2824_v47  ;;  %v38_v47 = vld [vmem:[%s5297_s0 + $0xd8] sm:$0xff] }
  0x1a   :  { %v2828_v53 = vpop.eup %2827  ;;  %2847 = vrcp.f32 %v715_v48  ;;  %v717_v54 = vadd.f32 1.0, %v2826_v50  ;;  %v37_v50 = vld [vmem:[%s5297_s0 + $0xd0] sm:$0xff]  ;;  %v2653_v56 = vmul.f32 -1.442695, %v38_v47 }
  0x1b   :  { %v2830_v57 = vpop.eup %2829  ;;  %2849 = vrcp.f32 %v718_v51  ;;  %v720_v58 = vadd.f32 1.0, %v2828_v53  ;;  %v40_v53 = vld [vmem:[%s5297_s0 + $0xe8] sm:$0xff]  ;;  %v2652_v60 = vmul.f32 -1.442695, %v37_v50 }
  0x1c   :  { %v2832_v61 = vpop.eup %2831  ;;  %1415 = vperm.xlu1 %2802, %v2830_v57   ;;  %2851 = vrcp.f32 %v717_v54  ;;  %v39_v57 = vld [vmem:[%s5297_s0 + $0xe0] sm:$0xff]  ;;  %v2655_v63 = vmul.f32 -1.442695, %v40_v53 }
  0x1d   :  { %v2834_v0 = vpop.eup %2833  ;;  %1405 = vperm.xlu0 %2801, %v2832_v61   ;;  %2853 = vrcp.f32 %v720_v58  ;;  %v42_v61 = vld [vmem:[%s5297_s0 + $0xf8] sm:$0xff]  ;;  %v2654_v2 = vmul.f32 -1.442695, %v39_v57 }
  0x1e   :  { %v2836_v3 = vpop.eup %2835  ;;  %2855 = vpow2.f32 %v2638_v55  ;;  %v2657_v5 = vmul.f32 -1.442695, %v42_v61 }
  0x1f   :  { %v2838_v6 = vpop.eup %2837  ;;  %2857 = vpow2.f32 %v2641_v59 }
  0x20   :  { %v2840_v9 = vpop.eup %2839  ;;  %1420 = vperm.xlu1 %2802, %v2834_v0   ;;  %2859 = vpow2.f32 %v2640_v62  ;;  %v41_v0 = vld [vmem:[%s5297_s0 + $0xf0] sm:$0xff] }
  0x21   :  { %v2842_v12 = vpop.eup %2841  ;;  %1410 = vperm.xlu0 %2801, %v2836_v3   ;;  %2861 = vpow2.f32 %v2643_v1  ;;  %v44_v3 = vld [vmem:[%s5297_s0 + $0x108] sm:$0xff]  ;;  %v2656_v8 = vmul.f32 -1.442695, %v41_v0 }
  0x22   :  { %v2844_v15 = vpop.eup %2843  ;;  %2863 = vpow2.f32 %v2642_v4  ;;  %v2659_v11 = vmul.f32 -1.442695, %v44_v3 }
  0x23   :  { %v2846_v18 = vpop.eup %2845  ;;  %2865 = vpow2.f32 %v2645_v7 }
  0x24   :  { %v2848_v21 = vpop.eup %2847  ;;  %1430 = vperm.xlu1 %2802, %v2838_v6   ;;  %2867 = vpow2.f32 %v2644_v10  ;;  %v43_v6 = vld [vmem:[%s5297_s0 + $0x100] sm:$0xff] }
  0x25   :  { %v2850_v23 = vpop.eup %2849  ;;  %1425 = vperm.xlu0 %2801, %v2840_v9   ;;  %2869 = vpow2.f32 %v2647_v13  ;;  %v46_v9 = vld [vmem:[%s5297_s0 + $0x118] sm:$0xff]  ;;  %v2658_v14 = vmul.f32 -1.442695, %v43_v6 }
  0x26   :  { %v2852_v25 = vpop.eup %2851  ;;  %2871 = vpow2.f32 %v2646_v16  ;;  %v2661_v17 = vmul.f32 -1.442695, %v46_v9 }
  0x27   :  { %v2854_v27 = vpop.eup %2853  ;;  %2873 = vpow2.f32 %v2649_v19 }
  0x28   :  { %v2856_v28 = vpop.eup %2855  ;;  %1440 = vperm.xlu1 %2802, %v2842_v12   ;;  %2875 = vpow2.f32 %v2648_v22  ;;  %v45_v12 = vld [vmem:[%s5297_s0 + $0x110] sm:$0xff] }
  0x29   :  { %v2858_v29 = vpop.eup %2857  ;;  %1435 = vperm.xlu0 %2801, %v2844_v15   ;;  %v719_v30 = vadd.f32 1.0, %v2856_v28  ;;  %2877 = vpow2.f32 %v2651_v24  ;;  %v48_v15 = vld [vmem:[%s5297_s0 + $0x128] sm:$0xff]  ;;  %v2660_v20 = vmul.f32 -1.442695, %v45_v12 }
  0x2a   :  { %v2860_v31 = vpop.eup %2859  ;;  %v722_v32 = vadd.f32 1.0, %v2858_v29  ;;  %2879 = vpow2.f32 %v2650_v26 }
  0x2b   :  { %v2862_v33 = vpop.eup %2861  ;;  %2881 = vrcp.f32 %v719_v30  ;;  %v721_v34 = vadd.f32 1.0, %v2860_v31 }
  0x2c   :  { %v2864_v35 = vpop.eup %2863  ;;  %1450 = vperm.xlu1 %2802, %v2846_v18   ;;  %2883 = vrcp.f32 %v722_v32  ;;  %v724_v36 = vadd.f32 1.0, %v2862_v33  ;;  %v47_v18 = vld [vmem:[%s5297_s0 + $0x120] sm:$0xff] }
  0x2d   :  { %v2866_v37 = vpop.eup %2865  ;;  %1445 = vperm.xlu0 %2801, %v2848_v21   ;;  %2885 = vrcp.f32 %v721_v34  ;;  %v723_v38 = vadd.f32 1.0, %v2864_v35  ;;  %v50_v21 = vld [vmem:[%s5297_s0 + $0x138] sm:$0xff] }
  0x2e   :  { %v2868_v39 = vpop.eup %2867  ;;  %2887 = vrcp.f32 %v724_v36  ;;  %v726_v40 = vadd.f32 1.0, %v2866_v37 }
  0x2f   :  { %v2870_v41 = vpop.eup %2869  ;;  %2889 = vrcp.f32 %v723_v38  ;;  %v725_v42 = vadd.f32 1.0, %v2868_v39 }
  0x30   :  { %v2872_v43 = vpop.eup %2871  ;;  %1460 = vperm.xlu1 %2802, %v2850_v23   ;;  %2891 = vrcp.f32 %v726_v40  ;;  %v728_v44 = vadd.f32 1.0, %v2870_v41  ;;  %v2663_v23 = vmul.f32 -1.442695, %v48_v15 }
  0x31   :  { %v2874_v45 = vpop.eup %2873  ;;  %1455 = vperm.xlu0 %2801, %v2852_v25   ;;  %2893 = vrcp.f32 %v725_v42  ;;  %v727_v46 = vadd.f32 1.0, %v2872_v43  ;;  %v2662_v25 = vmul.f32 -1.442695, %v47_v18 }
  0x32   :  { %v2876_v48 = vpop.eup %2875  ;;  %2895 = vrcp.f32 %v728_v44  ;;  %v730_v49 = vadd.f32 1.0, %v2874_v45 }
  0x33   :  { %v2878_v51 = vpop.eup %2877  ;;  %2897 = vrcp.f32 %v727_v46  ;;  %v729_v52 = vadd.f32 1.0, %v2876_v48  ;;  %v49_v48 = vld [vmem:[%s5297_s0 + $0x130] sm:$0xff] }
  0x34   :  { %v2880_v54 = vpop.eup %2879  ;;  %1470 = vperm.xlu1 %2802, %v2854_v27   ;;  %2899 = vrcp.f32 %v730_v49  ;;  %v732_v55 = vadd.f32 1.0, %v2878_v51  ;;  %v2665_v27 = vmul.f32 -1.442695, %v50_v21  ;;  %v52_v51 = vld [vmem:[%s5297_s0 + $0x148] sm:$0xff]  ;;  %v2664_v57 = vmul.f32 -1.442695, %v49_v48 }
  0x35   :  { %v2882_v58 = vpop.eup %2881  ;;  %2901 = vrcp.f32 %v729_v52  ;;  %v731_v59 = vadd.f32 1.0, %v2880_v54  ;;  %v51_v54 = vld [vmem:[%s5297_s0 + $0x140] sm:$0xff]  ;;  %v2667_v61 = vmul.f32 -1.442695, %v52_v51 }
  0x36   :  { %v2884_v62 = vpop.eup %2883  ;;  %1465 = vperm.xlu0 %2801, %v2882_v58   ;;  %2903 = vrcp.f32 %v732_v55  ;;  %v54_v58 = vld [vmem:[%s5297_s0 + $0x158] sm:$0xff]  ;;  %v2666_v0 = vmul.f32 -1.442695, %v51_v54 }
  0x37   :  { %v2886_v1 = vpop.eup %2885  ;;  %2905 = vrcp.f32 %v731_v59  ;;  %v2669_v3 = vmul.f32 -1.442695, %v54_v58 }
  0x38   :  { %v2888_v4 = vpop.eup %2887  ;;  %1480 = vperm.xlu1 %2802, %v2884_v62   ;;  %2907 = vpow2.f32 %v2653_v56  ;;  %v53_v62 = vld [vmem:[%s5297_s0 + $0x150] sm:$0xff] }
  0x39   :  { %v2890_v7 = vpop.eup %2889  ;;  %2909 = vpow2.f32 %v2652_v60  ;;  %v2668_v6 = vmul.f32 -1.442695, %v53_v62 }
  0x3a   :  { %v2892_v10 = vpop.eup %2891  ;;  %1475 = vperm.xlu0 %2801, %v2886_v1   ;;  %2911 = vpow2.f32 %v2655_v63  ;;  %v56_v1 = vld [vmem:[%s5297_s0 + $0x168] sm:$0xff] }
  0x3b   :  { %v2894_v13 = vpop.eup %2893  ;;  %2913 = vpow2.f32 %v2654_v2  ;;  %v2671_v9 = vmul.f32 -1.442695, %v56_v1 }
  0x3c   :  { %v2896_v16 = vpop.eup %2895  ;;  %1490 = vperm.xlu1 %2802, %v2888_v4   ;;  %2915 = vpow2.f32 %v2657_v5  ;;  %v55_v4 = vld [vmem:[%s5297_s0 + $0x160] sm:$0xff] }
  0x3d   :  { %v2898_v19 = vpop.eup %2897  ;;  %2917 = vpow2.f32 %v2656_v8  ;;  %v2670_v12 = vmul.f32 -1.442695, %v55_v4 }
  0x3e   :  { %v2900_v22 = vpop.eup %2899  ;;  %1485 = vperm.xlu0 %2801, %v2890_v7   ;;  %2919 = vpow2.f32 %v2659_v11  ;;  %v58_v7 = vld [vmem:[%s5297_s0 + $0x178] sm:$0xff] }
  0x3f   :  { %v2902_v24 = vpop.eup %2901  ;;  %2921 = vpow2.f32 %v2658_v14  ;;  %v2673_v15 = vmul.f32 -1.442695, %v58_v7 }
  0x40   :  { %v2904_v26 = vpop.eup %2903  ;;  %1500 = vperm.xlu1 %2802, %v2892_v10   ;;  %2923 = vpow2.f32 %v2661_v17  ;;  %v57_v10 = vld [vmem:[%s5297_s0 + $0x170] sm:$0xff] }
  0x41   :  { %v2906_v28 = vpop.eup %2905  ;;  %2925 = vpow2.f32 %v2660_v20  ;;  %v2672_v18 = vmul.f32 -1.442695, %v57_v10 }
  0x42   :  { %v2908_v29 = vpop.eup %2907  ;;  %1495 = vperm.xlu0 %2801, %v2894_v13   ;;  %2927 = vpow2.f32 %v2663_v23  ;;  %v60_v13 = vld [vmem:[%s5297_s0 + $0x188] sm:$0xff] }
  0x43   :  { %v2910_v30 = vpop.eup %2909  ;;  %v734_v31 = vadd.f32 1.0, %v2908_v29  ;;  %2929 = vpow2.f32 %v2662_v25  ;;  %v2675_v21 = vmul.f32 -1.442695, %v60_v13 }
  0x44   :  { %v2912_v32 = vpop.eup %2911  ;;  %1510 = vperm.xlu1 %2802, %v2896_v16   ;;  %v733_v33 = vadd.f32 1.0, %v2910_v30  ;;  %2931 = vpow2.f32 %v2665_v27  ;;  %v59_v16 = vld [vmem:[%s5297_s0 + $0x180] sm:$0xff] }
  0x45   :  { %v2914_v34 = vpop.eup %2913  ;;  %2933 = vrcp.f32 %v734_v31  ;;  %v736_v35 = vadd.f32 1.0, %v2912_v32 }
  0x46   :  { %v2916_v36 = vpop.eup %2915  ;;  %1505 = vperm.xlu0 %2801, %v2898_v19   ;;  %2935 = vrcp.f32 %v733_v33  ;;  %v735_v37 = vadd.f32 1.0, %v2914_v34  ;;  %v62_v19 = vld [vmem:[%s5297_s0 + $0x198] sm:$0xff] }
  0x47   :  { %v2918_v38 = vpop.eup %2917  ;;  %2937 = vrcp.f32 %v736_v35  ;;  %v738_v39 = vadd.f32 1.0, %v2916_v36 }
  0x48   :  { %v2920_v40 = vpop.eup %2919  ;;  %1520 = vperm.xlu1 %2802, %v2900_v22   ;;  %2939 = vrcp.f32 %v735_v37  ;;  %v737_v41 = vadd.f32 1.0, %v2918_v38  ;;  %v61_v22 = vld [vmem:[%s5297_s0 + $0x190] sm:$0xff] }
  0x49   :  { %v2922_v42 = vpop.eup %2921  ;;  %2941 = vrcp.f32 %v738_v39  ;;  %v740_v43 = vadd.f32 1.0, %v2920_v40 }
  0x4a   :  { %v2924_v44 = vpop.eup %2923  ;;  %1515 = vperm.xlu0 %2801, %v2902_v24   ;;  %2943 = vrcp.f32 %v737_v41  ;;  %v739_v45 = vadd.f32 1.0, %v2922_v42  ;;  %v2674_v24 = vmul.f32 -1.442695, %v59_v16 }
  0x4b   :  { %v2926_v46 = vpop.eup %2925  ;;  %2945 = vrcp.f32 %v740_v43  ;;  %v742_v47 = vadd.f32 1.0, %v2924_v44 }
  0x4c   :  { %v2928_v49 = vpop.eup %2927  ;;  %1530 = vperm.xlu1 %2802, %v2904_v26   ;;  %2947 = vrcp.f32 %v739_v45  ;;  %v741_v50 = vadd.f32 1.0, %v2926_v46  ;;  %v2677_v26 = vmul.f32 -1.442695, %v62_v19 }
  0x4d   :  { %v2930_v52 = vpop.eup %2929  ;;  %2949 = vrcp.f32 %v742_v47  ;;  %v744_v53 = vadd.f32 1.0, %v2928_v49  ;;  %v64_v49 = vld [vmem:[%s5297_s0 + $0x1a8] sm:$0xff] }
  0x4e   :  { %v2932_v55 = vpop.eup %2931  ;;  %1525 = vperm.xlu0 %2801, %v2906_v28   ;;  %2951 = vrcp.f32 %v741_v50  ;;  %v743_v56 = vadd.f32 1.0, %v2930_v52  ;;  %v2676_v28 = vmul.f32 -1.442695, %v61_v22  ;;  %v63_v52 = vld [vmem:[%s5297_s0 + $0x1a0] sm:$0xff]  ;;  %v2679_v58 = vmul.f32 -1.442695, %v64_v49 }
  0x4f   :  { %v2934_v59 = vpop.eup %2933  ;;  %2953 = vrcp.f32 %v744_v53  ;;  %v746_v60 = vadd.f32 1.0, %v2932_v55  ;;  %v66_v55 = vld [vmem:[%s5297_s0 + $0x1b8] sm:$0xff]  ;;  %v2678_v62 = vmul.f32 -1.442695, %v63_v52 }
  0x50   :  { %v2936_v63 = vpop.eup %2935  ;;  %1540 = vperm.xlu1 %2802, %v2934_v59   ;;  %2955 = vrcp.f32 %v743_v56  ;;  %v65_v59 = vld [vmem:[%s5297_s0 + $0x1b0] sm:$0xff]  ;;  %v2681_v1 = vmul.f32 -1.442695, %v66_v55 }
  0x51   :  { %v2938_v2 = vpop.eup %2937  ;;  %2957 = vrcp.f32 %v746_v60  ;;  %v2680_v4 = vmul.f32 -1.442695, %v65_v59 }
  0x52   :  { %v2940_v5 = vpop.eup %2939  ;;  %1535 = vperm.xlu0 %2801, %v2936_v63   ;;  %2959 = vpow2.f32 %v2664_v57  ;;  %v68_v63 = vld [vmem:[%s5297_s0 + $0x1c8] sm:$0xff] }
  0x53   :  { %v2942_v8 = vpop.eup %2941  ;;  %2961 = vpow2.f32 %v2667_v61  ;;  %v2683_v7 = vmul.f32 -1.442695, %v68_v63 }
  0x54   :  { %v2944_v11 = vpop.eup %2943  ;;  %1550 = vperm.xlu1 %2802, %v2938_v2   ;;  %2963 = vpow2.f32 %v2666_v0  ;;  %v67_v2 = vld [vmem:[%s5297_s0 + $0x1c0] sm:$0xff] }
  0x55   :  { %v2946_v14 = vpop.eup %2945  ;;  %2965 = vpow2.f32 %v2669_v3  ;;  %v2682_v10 = vmul.f32 -1.442695, %v67_v2 }
  0x56   :  { %v2948_v17 = vpop.eup %2947  ;;  %1545 = vperm.xlu0 %2801, %v2940_v5   ;;  %2967 = vpow2.f32 %v2668_v6  ;;  %v70_v5 = vld [vmem:[%s5297_s0 + $0x1d8] sm:$0xff] }
  0x57   :  { %v2950_v20 = vpop.eup %2949  ;;  %2969 = vpow2.f32 %v2671_v9  ;;  %v2685_v13 = vmul.f32 -1.442695, %v70_v5 }
  0x58   :  { %v2952_v23 = vpop.eup %2951  ;;  %1560 = vperm.xlu1 %2802, %v2942_v8   ;;  %2971 = vpow2.f32 %v2670_v12  ;;  %v69_v8 = vld [vmem:[%s5297_s0 + $0x1d0] sm:$0xff] }
  0x59   :  { %v2954_v25 = vpop.eup %2953  ;;  %2973 = vpow2.f32 %v2673_v15  ;;  %v2684_v16 = vmul.f32 -1.442695, %v69_v8 }
  0x5a   :  { %v2956_v27 = vpop.eup %2955  ;;  %1555 = vperm.xlu0 %2801, %v2944_v11   ;;  %2975 = vpow2.f32 %v2672_v18  ;;  %v72_v11 = vld [vmem:[%s5297_s0 + $0x1e8] sm:$0xff] }
  0x5b   :  { %v2958_v29 = vpop.eup %2957  ;;  %2977 = vpow2.f32 %v2675_v21  ;;  %v2687_v19 = vmul.f32 -1.442695, %v72_v11 }
  0x5c   :  { %v2960_v30 = vpop.eup %2959  ;;  %1570 = vperm.xlu1 %2802, %v2946_v14   ;;  %2979 = vpow2.f32 %v2674_v24  ;;  %v71_v14 = vld [vmem:[%s5297_s0 + $0x1e0] sm:$0xff] }
  0x5d   :  { %v2962_v31 = vpop.eup %2961  ;;  %v745_v32 = vadd.f32 1.0, %v2960_v30  ;;  %2981 = vpow2.f32 %v2677_v26  ;;  %v2686_v22 = vmul.f32 -1.442695, %v71_v14 }
  0x5e   :  { %v2964_v33 = vpop.eup %2963  ;;  %1565 = vperm.xlu0 %2801, %v2948_v17   ;;  %v748_v34 = vadd.f32 1.0, %v2962_v31  ;;  %2983 = vpow2.f32 %v2676_v28  ;;  %v74_v17 = vld [vmem:[%s5297_s0 + $0x1f8] sm:$0xff] }
  0x5f   :  { %v2966_v35 = vpop.eup %2965  ;;  %2985 = vrcp.f32 %v745_v32  ;;  %v747_v36 = vadd.f32 1.0, %v2964_v33 }
  0x60   :  { %v2968_v37 = vpop.eup %2967  ;;  %1580 = vperm.xlu1 %2802, %v2950_v20   ;;  %2987 = vrcp.f32 %v748_v34  ;;  %v750_v38 = vadd.f32 1.0, %v2966_v35  ;;  %v73_v20 = vld [vmem:[%s5297_s0 + $0x1f0] sm:$0xff] }
  0x61   :  { %v2970_v39 = vpop.eup %2969  ;;  %2989 = vrcp.f32 %v747_v36  ;;  %v749_v40 = vadd.f32 1.0, %v2968_v37 }
  0x62   :  { %v2972_v41 = vpop.eup %2971  ;;  %1575 = vperm.xlu0 %2801, %v2952_v23   ;;  %2991 = vrcp.f32 %v750_v38  ;;  %v752_v42 = vadd.f32 1.0, %v2970_v39  ;;  %v76_v23 = vld [vmem:[%s5297_s0 + $0x208] sm:$0xff] }
  0x63   :  { %v2974_v43 = vpop.eup %2973  ;;  %2993 = vrcp.f32 %v749_v40  ;;  %v751_v44 = vadd.f32 1.0, %v2972_v41 }
  0x64   :  { %v2976_v45 = vpop.eup %2975  ;;  %1590 = vperm.xlu1 %2802, %v2954_v25   ;;  %2995 = vrcp.f32 %v752_v42  ;;  %v754_v46 = vadd.f32 1.0, %v2974_v43  ;;  %v2689_v25 = vmul.f32 -1.442695, %v74_v17 }
  0x65   :  { %v2978_v47 = vpop.eup %2977  ;;  %2997 = vrcp.f32 %v751_v44  ;;  %v753_v48 = vadd.f32 1.0, %v2976_v45 }
  0x66   :  { %v2980_v50 = vpop.eup %2979  ;;  %1585 = vperm.xlu0 %2801, %v2956_v27   ;;  %2999 = vrcp.f32 %v754_v46  ;;  %v756_v51 = vadd.f32 1.0, %v2978_v47  ;;  %v2688_v27 = vmul.f32 -1.442695, %v73_v20 }
  0x67   :  { %v2982_v53 = vpop.eup %2981  ;;  %3001 = vrcp.f32 %v753_v48  ;;  %v755_v54 = vadd.f32 1.0, %v2980_v50  ;;  %v75_v50 = vld [vmem:[%s5297_s0 + $0x200] sm:$0xff] }
  0x68   :  { %v2984_v56 = vpop.eup %2983  ;;  %1600 = vperm.xlu1 %2802, %v2958_v29   ;;  %3003 = vrcp.f32 %v756_v51  ;;  %v758_v57 = vadd.f32 1.0, %v2982_v53  ;;  %v2691_v29 = vmul.f32 -1.442695, %v76_v23  ;;  %v78_v53 = vld [vmem:[%s5297_s0 + $0x218] sm:$0xff]  ;;  %v2690_v59 = vmul.f32 -1.442695, %v75_v50 }
  0x69   :  { %v2986_v60 = vpop.eup %2985  ;;  %3005 = vrcp.f32 %v755_v54  ;;  %v757_v61 = vadd.f32 1.0, %v2984_v56  ;;  %v77_v56 = vld [vmem:[%s5297_s0 + $0x210] sm:$0xff]  ;;  %v2693_v63 = vmul.f32 -1.442695, %v78_v53 }
  0x6a   :  { %v2988_v0 = vpop.eup %2987  ;;  %1595 = vperm.xlu0 %2801, %v2986_v60   ;;  %3007 = vrcp.f32 %v758_v57  ;;  %v80_v60 = vld [vmem:[%s5297_s0 + $0x228] sm:$0xff]  ;;  %v2692_v2 = vmul.f32 -1.442695, %v77_v56  ;;  %v1231_v50 = vld [vmem:[%s5298_s1 + $0x10] sm:$0xff] }
  0x6b   :  { %v2990_v3 = vpop.eup %2989  ;;  %3009 = vrcp.f32 %v757_v61  ;;  %v2695_v5 = vmul.f32 -1.442695, %v80_v60  ;;  %v89_v56 = vld [vmem:[%s5297_s0 + $0x270] sm:$0xff]  ;;  %v92_v60 = vld [vmem:[%s5297_s0 + $0x288] sm:$0xff] }
  0x6c   :  { %v2992_v6 = vpop.eup %2991  ;;  %1610 = vperm.xlu1 %2802, %v2988_v0   ;;  %3011 = vpow2.f32 %v2679_v58  ;;  %v79_v0 = vld [vmem:[%s5297_s0 + $0x220] sm:$0xff] }
  0x6d   :  { %v2994_v9 = vpop.eup %2993  ;;  %3013 = vpow2.f32 %v2678_v62  ;;  %v2694_v8 = vmul.f32 -1.442695, %v79_v0 }
  0x6e   :  { %v2996_v12 = vpop.eup %2995  ;;  %1605 = vperm.xlu0 %2801, %v2990_v3   ;;  %3015 = vpow2.f32 %v2681_v1  ;;  %v82_v3 = vld [vmem:[%s5297_s0 + $0x238] sm:$0xff] }
  0x6f   :  { %v2998_v15 = vpop.eup %2997  ;;  %3017 = vpow2.f32 %v2680_v4  ;;  %v2697_v11 = vmul.f32 -1.442695, %v82_v3 }
  0x70   :  { %v3000_v18 = vpop.eup %2999  ;;  %1620 = vperm.xlu1 %2802, %v2992_v6   ;;  %3019 = vpow2.f32 %v2683_v7  ;;  %v81_v6 = vld [vmem:[%s5297_s0 + $0x230] sm:$0xff] }
  0x71   :  { %v3002_v21 = vpop.eup %3001  ;;  %3021 = vpow2.f32 %v2682_v10  ;;  %v2696_v14 = vmul.f32 -1.442695, %v81_v6 }
  0x72   :  { %v3004_v24 = vpop.eup %3003  ;;  %1615 = vperm.xlu0 %2801, %v2994_v9   ;;  %3023 = vpow2.f32 %v2685_v13  ;;  %v84_v9 = vld [vmem:[%s5297_s0 + $0x248] sm:$0xff] }
  0x73   :  { %v3006_v26 = vpop.eup %3005  ;;  %3025 = vpow2.f32 %v2684_v16  ;;  %v2699_v17 = vmul.f32 -1.442695, %v84_v9 }
  0x74   :  { %v3008_v28 = vpop.eup %3007  ;;  %1630 = vperm.xlu1 %2802, %v2996_v12   ;;  %3027 = vpow2.f32 %v2687_v19  ;;  %v83_v12 = vld [vmem:[%s5297_s0 + $0x240] sm:$0xff] }
  0x75   :  { %v3010_v30 = vpop.eup %3009  ;;  %3029 = vpow2.f32 %v2686_v22  ;;  %v2698_v20 = vmul.f32 -1.442695, %v83_v12  ;;  %v93_v12 = vld [vmem:[%s5297_s0 + $0x290] sm:$0xff] }
  0x76   :  { %v3012_v31 = vpop.eup %3011  ;;  %1625 = vperm.xlu0 %2801, %v2998_v15   ;;  %3031 = vpow2.f32 %v2689_v25  ;;  %v86_v15 = vld [vmem:[%s5297_s0 + $0x258] sm:$0xff] }
  0x77   :  { %v3014_v32 = vpop.eup %3013  ;;  %v760_v33 = vadd.f32 1.0, %v3012_v31  ;;  %3033 = vpow2.f32 %v2688_v27  ;;  %v2701_v23 = vmul.f32 -1.442695, %v86_v15 }
  0x78   :  { %v3016_v34 = vpop.eup %3015  ;;  %1640 = vperm.xlu1 %2802, %v3000_v18   ;;  %v759_v35 = vadd.f32 1.0, %v3014_v32  ;;  %3035 = vpow2.f32 %v2691_v29  ;;  %v85_v18 = vld [vmem:[%s5297_s0 + $0x250] sm:$0xff] }
  0x79   :  { %v3018_v36 = vpop.eup %3017  ;;  %3037 = vrcp.f32 %v760_v33  ;;  %v762_v37 = vadd.f32 1.0, %v3016_v34 }
  0x7a   :  { %v3020_v38 = vpop.eup %3019  ;;  %1635 = vperm.xlu0 %2801, %v3002_v21   ;;  %3039 = vrcp.f32 %v759_v35  ;;  %v761_v39 = vadd.f32 1.0, %v3018_v36  ;;  %v88_v21 = vld [vmem:[%s5297_s0 + $0x268] sm:$0xff] }
  0x7b   :  { %v3022_v40 = vpop.eup %3021  ;;  %3041 = vrcp.f32 %v762_v37  ;;  %v764_v41 = vadd.f32 1.0, %v3020_v38 }
  0x7c   :  { %v3024_v42 = vpop.eup %3023  ;;  %1650 = vperm.xlu1 %2802, %v3004_v24   ;;  %3043 = vrcp.f32 %v761_v39  ;;  %v763_v43 = vadd.f32 1.0, %v3022_v40  ;;  %v87_v24 = vld [vmem:[%s5297_s0 + $0x260] sm:$0xff] }
  0x7d   :  { %v3026_v44 = vpop.eup %3025  ;;  %3045 = vrcp.f32 %v764_v41  ;;  %v766_v45 = vadd.f32 1.0, %v3024_v42 }
  0x7e   :  { %v3028_v46 = vpop.eup %3027  ;;  %1645 = vperm.xlu0 %2801, %v3006_v26   ;;  %3047 = vrcp.f32 %v763_v43  ;;  %v765_v47 = vadd.f32 1.0, %v3026_v44  ;;  %v2700_v26 = vmul.f32 -1.442695, %v85_v18 }
  0x7f   :  { %v3030_v48 = vpop.eup %3029  ;;  %3049 = vrcp.f32 %v766_v45  ;;  %v768_v49 = vadd.f32 1.0, %v3028_v46 }
  0x80   :  { %v3032_v51 = vpop.eup %3031  ;;  %1660 = vperm.xlu1 %2802, %v3008_v28   ;;  %3051 = vrcp.f32 %v765_v47  ;;  %v767_v52 = vadd.f32 1.0, %v3030_v48  ;;  %v2703_v28 = vmul.f32 -1.442695, %v88_v21  ;;  %v95_v21 = vld [vmem:[%s5297_s0 + $0x2a0] sm:$0xff] }
  0x81   :  { %v3034_v54 = vpop.eup %3033  ;;  %3053 = vrcp.f32 %v768_v49  ;;  %v770_v55 = vadd.f32 1.0, %v3032_v51 }
  0x82   :  { %v3036_v57 = vpop.eup %3035  ;;  %1655 = vperm.xlu0 %2801, %v3010_v30   ;;  %3055 = vrcp.f32 %v767_v52  ;;  %v769_v58 = vadd.f32 1.0, %v3034_v54  ;;  %v2702_v30 = vmul.f32 -1.442695, %v87_v24  ;;  %v90_v52 = vld [vmem:[%s5297_s0 + $0x278] sm:$0xff]  ;;  %v1229_v54 = vld [vmem:[%s5298_s1] sm:$0xff]  ;;  %v1234_v24 = vld [vmem:[%s5298_s1 + $0x28] sm:$0xff] }
  0x83   :  { %v3038_v61 = vpop.eup %3037  ;;  %3057 = vrcp.f32 %v770_v55  ;;  %v772_v62 = vadd.f32 1.0, %v3036_v57 }
  0x84   :  { %v3040_v1 = vpop.eup %3039  ;;  %1670 = vperm.xlu1 %2802, %v3038_v61   ;;  %3059 = vrcp.f32 %v769_v58 }
  0x85   :  { %v3042_v4 = vpop.eup %3041  ;;  %3061 = vrcp.f32 %v772_v62 }
  0x86   :  { %v3044_v7 = vpop.eup %3043  ;;  %1665 = vperm.xlu0 %2801, %v3040_v1   ;;  %3063 = vpow2.f32 %v2690_v59  ;;  %v2705_v1 = vmul.f32 -1.442695, %v90_v52 }
  0x87   :  { %v3046_v10 = vpop.eup %3045  ;;  %3065 = vpow2.f32 %v2693_v63 }
  0x88   :  { %v3048_v13 = vpop.eup %3047  ;;  %1680 = vperm.xlu1 %2802, %v3042_v4   ;;  %3067 = vpow2.f32 %v2692_v2  ;;  %v91_v2 = vld [vmem:[%s5297_s0 + $0x280] sm:$0xff] }
  0x89   :  { %v3050_v16 = vpop.eup %3049  ;;  %3069 = vpow2.f32 %v2695_v5  ;;  %v1232_v5 = vld [vmem:[%s5298_s1 + $0x18] sm:$0xff]  ;;  %v2706_v15 = vmul.f32 -1.442695, %v91_v2 }
  0x8a   :  { %v3052_v19 = vpop.eup %3051  ;;  %1675 = vperm.xlu0 %2801, %v3044_v7   ;;  %3071 = vpow2.f32 %v2694_v8  ;;  %v2704_v7 = vmul.f32 -1.442695, %v89_v56  ;;  %v94_v8 = vld [vmem:[%s5297_s0 + $0x298] sm:$0xff] }
  0x8b   :  { %v3054_v22 = vpop.eup %3053  ;;  %3073 = vpow2.f32 %v2697_v11  ;;  %v2707_v11 = vmul.f32 -1.442695, %v92_v60 }
  0x8c   :  { %v3056_v25 = vpop.eup %3055  ;;  %1690 = vperm.xlu1 %2802, %v3046_v10   ;;  %3075 = vpow2.f32 %v2696_v14  ;;  %v1230_v10 = vld [vmem:[%s5298_s1 + $0x8] sm:$0xff] }
  0x8d   :  { %v3058_v27 = vpop.eup %3057  ;;  %3077 = vpow2.f32 %v2699_v17 }
  0x8e   :  { %v3060_v29 = vpop.eup %3059  ;;  %1685 = vperm.xlu0 %2801, %v3048_v13   ;;  %3079 = vpow2.f32 %v2698_v20  ;;  %v2709_v20 = vmul.f32 -1.442695, %v94_v8  ;;  %v1239_v8 = vld [vmem:[%s5298_s1 + $0x50] sm:$0xff] }
  0x8f   :  { %v3062_v31 = vpop.eup %3061  ;;  %3081 = vpow2.f32 %v2701_v23 }
  0x90   :  { %v3064_v32 = vpop.eup %3063  ;;  %1700 = vperm.xlu1 %2802, %v3050_v16   ;;  %3083 = vpow2.f32 %v2700_v26  ;;  %v96_v16 = vld [vmem:[%s5297_s0 + $0x2a8] sm:$0xff]  ;;  %v98_v26 = vld [vmem:[%s5297_s0 + $0x2b8] sm:$0xff] }
  0x91   :  { %v3066_v33 = vpop.eup %3065  ;;  %v771_v34 = vadd.f32 1.0, %v3064_v32  ;;  %3085 = vpow2.f32 %v2703_v28  ;;  %v1233_v28 = vld [vmem:[%s5298_s1 + $0x20] sm:$0xff] }
  0x92   :  { %v3068_v35 = vpop.eup %3067  ;;  %1695 = vperm.xlu0 %2801, %v3052_v19   ;;  %v774_v36 = vadd.f32 1.0, %v3066_v33  ;;  %3087 = vpow2.f32 %v2702_v30  ;;  %v97_v30 = vld [vmem:[%s5297_s0 + $0x2b0] sm:$0xff]  ;;  %v2710_v33 = vmul.f32 -1.442695, %v95_v21 }
  0x93   :  { %v3070_v37 = vpop.eup %3069  ;;  %3089 = vrcp.f32 %v771_v34  ;;  %v773_v38 = vadd.f32 1.0, %v3068_v35  ;;  %v100_v34 = vld [vmem:[%s5297_s0 + $0x2c8] sm:$0xff] }
  0x94   :  { %v3072_v39 = vpop.eup %3071  ;;  %1710 = vperm.xlu1 %2802, %v3054_v22   ;;  %3091 = vrcp.f32 %v774_v36  ;;  %v776_v40 = vadd.f32 1.0, %v3070_v37 }
  0x95   :  { %v3074_v41 = vpop.eup %3073  ;;  %3093 = vrcp.f32 %v773_v38  ;;  %v775_v42 = vadd.f32 1.0, %v3072_v39  ;;  %v2713_v38 = vmul.f32 -1.442695, %v98_v26  ;;  %v99_v39 = vld [vmem:[%s5297_s0 + $0x2c0] sm:$0xff] }
  0x96   :  { %v3076_v43 = vpop.eup %3075  ;;  %1705 = vperm.xlu0 %2801, %v3056_v25   ;;  %3095 = vrcp.f32 %v776_v40  ;;  %v778_v44 = vadd.f32 1.0, %v3074_v41  ;;  %v2708_v25 = vmul.f32 -1.442695, %v93_v12 }
  0x97   :  { %v3078_v45 = vpop.eup %3077  ;;  %3097 = vrcp.f32 %v775_v42  ;;  %v777_v46 = vadd.f32 1.0, %v3076_v43  ;;  %v1236_v42 = vld [vmem:[%s5298_s1 + $0x38] sm:$0xff]  ;;  %v2712_v43 = vmul.f32 -1.442695, %v97_v30 }
  0x98   :  { %v3080_v47 = vpop.eup %3079  ;;  %1720 = vperm.xlu1 %2802, %v3058_v27   ;;  %3099 = vrcp.f32 %v778_v44  ;;  %v780_v48 = vadd.f32 1.0, %v3078_v45  ;;  %v102_v44 = vld [vmem:[%s5297_s0 + $0x2d8] sm:$0xff] }
  0x99   :  { %v3082_v49 = vpop.eup %3081  ;;  %3101 = vrcp.f32 %v777_v46  ;;  %v779_v51 = vadd.f32 1.0, %v3080_v47  ;;  %v1235_v46 = vld [vmem:[%s5298_s1 + $0x30] sm:$0xff]  ;;  %v2715_v47 = vmul.f32 -1.442695, %v100_v34  ;;  %v1244_v34 = vld [vmem:[%s5298_s1 + $0x78] sm:$0xff] }
  0x9a   :  { %v3084_v53 = vpop.eup %3083  ;;  %1715 = vperm.xlu0 %2801, %v3060_v29   ;;  %3103 = vrcp.f32 %v780_v48  ;;  %v782_v55 = vadd.f32 1.0, %v3082_v49  ;;  %v2711_v29 = vmul.f32 -1.442695, %v96_v16 }
  0x9b   :  { %v3086_v57 = vpop.eup %3085  ;;  %v1416_v58 = vpop.permute.xlu1 %1415  ;;  %3105 = vrcp.f32 %v779_v51  ;;  %v781_v59 = vadd.f32 1.0, %v3084_v53 }
  0x9c   :  { %v3088_v61 = vpop.eup %3087  ;;  %v2275_v62 = vmul.f32 %v1416_v58, %v1231_v50  ;;  %v1406_v63 = vpop.permute.xlu0 %1405  ;;  %1730 = vperm.xlu1 %2802, %v3062_v31   ;;  %3107 = vrcp.f32 %v782_v55  ;;  %v784_v0 = vadd.f32 1.0, %v3086_v57  ;;  %v2714_v50 = vmul.f32 -1.442695, %v99_v39  ;;  %v1238_v57 = vld [vmem:[%s5298_s1 + $0x48] sm:$0xff] }
  0x9d   :  { %v3090_v3 = vpop.eup %3089  ;;  %v2273_v4 = vmul.f32 %v1406_v63, %v1229_v54  ;;  %3109 = vrcp.f32 %v781_v59  ;;  %v783_v6 = vadd.f32 1.0, %v3088_v61  ;;  %v2717_v54 = vmul.f32 -1.442695, %v102_v44  ;;  %v1237_v59 = vld [vmem:[%s5298_s1 + $0x40] sm:$0xff]  ;;  %v1243_v44 = vld [vmem:[%s5298_s1 + $0x70] sm:$0xff] }
  0x9e   :  { %v3092_v9 = vpop.eup %3091  ;;  %2450 = vst.msk [vmem:[%s5299_s2 + $0x10] sm:$0xff] %vm2447_vm0, %v2275_v62  ;;  %1725 = vperm.xlu0 %2801, %v3090_v3   ;;  %3111 = vrcp.f32 %v784_v0 }
  0x9f   :  { %v3094_v13 = vpop.eup %3093  ;;  %2448 = vst.msk [vmem:[%s5299_s2] sm:$0xff] %vm2447_vm0, %v2273_v4  ;;  %v1421_v14 = vpop.permute.xlu1 %1420  ;;  %3113 = vrcp.f32 %v783_v6 }
  0xa0   :  { %v3096_v17 = vpop.eup %3095  ;;  %v2276_v18 = vmul.f32 %v1421_v14, %v1232_v5  ;;  %v1411_v19 = vpop.permute.xlu0 %1410  ;;  %1740 = vperm.xlu1 %2802, %v3092_v9   ;;  %3115 = vpow2.f32 %v2705_v1  ;;  %v1240_v5 = vld [vmem:[%s5298_s1 + $0x58] sm:$0xff] }
  0xa1   :  { %v3098_v22 = vpop.eup %3097  ;;  %v2274_v23 = vmul.f32 %v1411_v19, %v1230_v10  ;;  %3117 = vpow2.f32 %v2704_v7  ;;  %v1242_v19 = vld [vmem:[%s5298_s1 + $0x68] sm:$0xff] }
  0xa2   :  { %v3100_v27 = vpop.eup %3099  ;;  %2451 = vst.msk [vmem:[%s5299_s2 + $0x18] sm:$0xff] %vm2447_vm0, %v2276_v18  ;;  %1735 = vperm.xlu0 %2801, %v3094_v13   ;;  %3119 = vpow2.f32 %v2707_v11 }
  0xa3   :  { %v3102_v31 = vpop.eup %3101  ;;  %2449 = vst.msk [vmem:[%s5299_s2 + $0x8] sm:$0xff] %vm2447_vm0, %v2274_v23  ;;  %v1431_v32 = vpop.permute.xlu1 %1430  ;;  %3121 = vpow2.f32 %v2706_v15 }
  0xa4   :  { %v3104_v35 = vpop.eup %3103  ;;  %v2278_v36 = vmul.f32 %v1431_v32, %v1234_v24  ;;  %v1426_v37 = vpop.permute.xlu0 %1425  ;;  %1750 = vperm.xlu1 %2802, %v3096_v17   ;;  %3123 = vpow2.f32 %v2709_v20 }
  0xa5   :  { %v3106_v40 = vpop.eup %3105  ;;  %v2277_v41 = vmul.f32 %v1426_v37, %v1233_v28  ;;  %3125 = vpow2.f32 %v2708_v25  ;;  %v1241_v25 = vld [vmem:[%s5298_s1 + $0x60] sm:$0xff] }
  0xa6   :  { %v3108_v45 = vpop.eup %3107  ;;  %2453 = vst.msk [vmem:[%s5299_s2 + $0x28] sm:$0xff] %vm2447_vm0, %v2278_v36  ;;  %1745 = vperm.xlu0 %2801, %v3098_v22   ;;  %3127 = vpow2.f32 %v2711_v29  ;;  %v103_v36 = vld [vmem:[%s5297_s0 + $0x2e0] sm:$0xff] }
  0xa7   :  { %v3110_v48 = vpop.eup %3109  ;;  %2452 = vst.msk [vmem:[%s5299_s2 + $0x20] sm:$0xff] %vm2447_vm0, %v2277_v41  ;;  %v1441_v49 = vpop.permute.xlu1 %1440  ;;  %3129 = vpow2.f32 %v2710_v33  ;;  %v106_v41 = vld [vmem:[%s5297_s0 + $0x2f8] sm:$0xff] }
  0xa8   :  { %v3836_v51 = vpop.eup %3111  ;;  %v2280_v52 = vmul.f32 %v1441_v49, %v1236_v42  ;;  %v1436_v53 = vpop.permute.xlu0 %1435  ;;  %1760 = vperm.xlu1 %2802, %v3100_v27   ;;  %3131 = vpow2.f32 %v2713_v38  ;;  %v101_v27 = vld [vmem:[%s5297_s0 + $0x2d0] sm:$0xff] }
  0xa9   :  { %v3838_v55 = vpop.eup %3113  ;;  %v2279_v56 = vmul.f32 %v1436_v53, %v1235_v46  ;;  %3133 = vpow2.f32 %v2712_v43 }
  0xaa   :  { %v3116_v58 = vpop.eup %3115  ;;  %2455 = vst.msk [vmem:[%s5299_s2 + $0x38] sm:$0xff] %vm2447_vm0, %v2280_v52  ;;  %1755 = vperm.xlu0 %2801, %v3102_v31   ;;  %3135 = vpow2.f32 %v2715_v47  ;;  %v104_v31 = vld [vmem:[%s5297_s0 + $0x2e8] sm:$0xff]  ;;  %v105_v47 = vld [vmem:[%s5297_s0 + $0x2f0] sm:$0xff] }
  0xab   :  { %v3118_v60 = vpop.eup %3117  ;;  %2454 = vst.msk [vmem:[%s5299_s2 + $0x30] sm:$0xff] %vm2447_vm0, %v2279_v56  ;;  %v1451_v61 = vpop.permute.xlu1 %1450  ;;  %v786_v62 = vadd.f32 1.0, %v3116_v58  ;;  %3137 = vpow2.f32 %v2714_v50  ;;  %v2719_v46 = vmul.f32 -1.442695, %v104_v31  ;;  %v2718_v50 = vmul.f32 -1.442695, %v103_v36 }
  0xac   :  { %v3120_v63 = vpop.eup %3119  ;;  %v2282_v0 = vmul.f32 %v1451_v61, %v1238_v57  ;;  %v1446_v1 = vpop.permute.xlu0 %1445  ;;  %1770 = vperm.xlu1 %2802, %v3104_v35   ;;  %v785_v2 = vadd.f32 1.0, %v3118_v60  ;;  %3139 = vpow2.f32 %v2717_v54  ;;  %v1246_v54 = vld [vmem:[%s5298_s1 + $0x88] sm:$0xff]  ;;  %v107_v56 = vld [vmem:[%s5297_s0 + $0x300] sm:$0xff]  ;;  %v110_v60 = vld [vmem:[%s5297_s0 + $0x318] sm:$0xff] }
  0xad   :  { %v3122_v3 = vpop.eup %3121  ;;  %v2281_v4 = vmul.f32 %v1446_v1, %v1237_v59  ;;  %3141 = vrcp.f32 %v786_v62  ;;  %v788_v6 = vadd.f32 1.0, %v3120_v63  ;;  %v2720_v59 = vmul.f32 -1.442695, %v105_v47  ;;  %v1245_v63 = vld [vmem:[%s5298_s1 + $0x80] sm:$0xff]  ;;  %v109_v1 = vld [vmem:[%s5297_s0 + $0x310] sm:$0xff] }
  0xae   :  { %v3124_v7 = vpop.eup %3123  ;;  %2457 = vst.msk [vmem:[%s5299_s2 + $0x48] sm:$0xff] %vm2447_vm0, %v2282_v0  ;;  %1765 = vperm.xlu0 %2801, %v3106_v40   ;;  %3143 = vrcp.f32 %v785_v2  ;;  %v787_v9 = vadd.f32 1.0, %v3122_v3  ;;  %v2716_v40 = vmul.f32 -1.442695, %v101_v27 }
  0xaf   :  { %v3126_v10 = vpop.eup %3125  ;;  %2456 = vst.msk [vmem:[%s5299_s2 + $0x40] sm:$0xff] %vm2447_vm0, %v2281_v4  ;;  %v1461_v11 = vpop.permute.xlu1 %1460  ;;  %3145 = vrcp.f32 %v788_v6  ;;  %v790_v12 = vadd.f32 1.0, %v3124_v7  ;;  %v2722_v4 = vmul.f32 -1.442695, %v107_v56 }
  0xb0   :  { %v3128_v13 = vpop.eup %3127  ;;  %v2284_v14 = vmul.f32 %v1461_v11, %v1240_v5  ;;  %v1456_v15 = vpop.permute.xlu0 %1455  ;;  %1780 = vperm.xlu1 %2802, %v3108_v45   ;;  %3147 = vrcp.f32 %v787_v9  ;;  %v789_v16 = vadd.f32 1.0, %v3126_v10  ;;  %v112_v5 = vld [vmem:[%s5297_s0 + $0x328] sm:$0xff]  ;;  %v2725_v9 = vmul.f32 -1.442695, %v110_v60  ;;  %v111_v10 = vld [vmem:[%s5297_s0 + $0x320] sm:$0xff] }
  0xb1   :  { %v3130_v17 = vpop.eup %3129  ;;  %v2283_v18 = vmul.f32 %v1456_v15, %v1239_v8  ;;  %3149 = vrcp.f32 %v790_v12  ;;  %v792_v20 = vadd.f32 1.0, %v3128_v13  ;;  %v1248_v8 = vld [vmem:[%s5298_s1 + $0x98] sm:$0xff]  ;;  %v2724_v13 = vmul.f32 -1.442695, %v109_v1 }
  0xb2   :  { %v3132_v21 = vpop.eup %3131  ;;  %2459 = vst.msk [vmem:[%s5299_s2 + $0x58] sm:$0xff] %vm2447_vm0, %v2284_v14  ;;  %1775 = vperm.xlu0 %2801, %v3110_v48   ;;  %3151 = vrcp.f32 %v789_v16  ;;  %v791_v22 = vadd.f32 1.0, %v3130_v17  ;;  %v114_v14 = vld [vmem:[%s5297_s0 + $0x338] sm:$0xff]  ;;  %v1247_v17 = vld [vmem:[%s5298_s1 + $0x90] sm:$0xff] }
  0xb3   :  { %v3134_v23 = vpop.eup %3133  ;;  %2458 = vst.msk [vmem:[%s5299_s2 + $0x50] sm:$0xff] %vm2447_vm0, %v2283_v18  ;;  %v1471_v24 = vpop.permute.xlu1 %1470  ;;  %3153 = vrcp.f32 %v792_v20  ;;  %v794_v26 = vadd.f32 1.0, %v3132_v21  ;;  %v2727_v18 = vmul.f32 -1.442695, %v112_v5  ;;  %v1256_v1 = vld [vmem:[%s5298_s1 + $0xd8] sm:$0xff] }
  0xb4   :  { %v3136_v28 = vpop.eup %3135  ;;  %v2286_v29 = vmul.f32 %v1471_v24, %v1242_v19  ;;  %1790 = vperm.xlu1 %2802, %v3836_v51   ;;  %3155 = vrcp.f32 %v791_v22  ;;  %v793_v30 = vadd.f32 1.0, %v3134_v23  ;;  %v108_v51 = vld [vmem:[%s5297_s0 + $0x308] sm:$0xff]  ;;  %v113_v19 = vld [vmem:[%s5297_s0 + $0x330] sm:$0xff]  ;;  %v2726_v22 = vmul.f32 -1.442695, %v111_v10 }
  0xb5   :  { %v3138_v32 = vpop.eup %3137  ;;  %v1466_v33 = vpop.permute.xlu0 %1465  ;;  %3157 = vrcp.f32 %v794_v26  ;;  %v796_v35 = vadd.f32 1.0, %v3136_v28  ;;  %v2723_v0 = vmul.f32 -1.442695, %v108_v51  ;;  %v2729_v26 = vmul.f32 -1.442695, %v114_v14  ;;  %v1254_v51 = vld [vmem:[%s5298_s1 + $0xc8] sm:$0xff] }
  0xb6   :  { %v3140_v37 = vpop.eup %3139  ;;  %2461 = vst.msk [vmem:[%s5299_s2 + $0x68] sm:$0xff] %vm2447_vm0, %v2286_v29  ;;  %v2285_v38 = vmul.f32 %v1466_v33, %v1241_v25  ;;  %1785 = vperm.xlu0 %2801, %v3838_v55   ;;  %3159 = vrcp.f32 %v793_v30  ;;  %v795_v39 = vadd.f32 1.0, %v3138_v32  ;;  %v2721_v55 = vmul.f32 -1.442695, %v106_v41  ;;  %v1250_v25 = vld [vmem:[%s5298_s1 + $0xa8] sm:$0xff]  ;;  %v1249_v32 = vld [vmem:[%s5298_s1 + $0xa0] sm:$0xff] }
  0xb7   :  { %v3142_v42 = vpop.eup %3141  ;;  %v1481_v43 = vpop.permute.xlu1 %1480  ;;  %3161 = vrcp.f32 %v796_v35  ;;  %v798_v45 = vadd.f32 1.0, %v3140_v37  ;;  %v2728_v29 = vmul.f32 -1.442695, %v113_v19  ;;  %v1252_v37 = vld [vmem:[%s5298_s1 + $0xb8] sm:$0xff]  ;;  %v1255_v10 = vld [vmem:[%s5298_s1 + $0xd0] sm:$0xff] }
  0xb8   :  { %v3144_v48 = vpop.eup %3143  ;;  %2460 = vst.msk [vmem:[%s5299_s2 + $0x60] sm:$0xff] %vm2447_vm0, %v2285_v38  ;;  %v2288_v49 = vmul.f32 %v1481_v43, %v1244_v34  ;;  %1800 = vperm.xlu1 %2802, %v3142_v42   ;;  %3163 = vrcp.f32 %v795_v39 }
  0xb9   :  { %v3146_v52 = vpop.eup %3145  ;;  %v1476_v53 = vpop.permute.xlu0 %1475  ;;  %3165 = vrcp.f32 %v798_v45 }
  0xba   :  { %v3148_v57 = vpop.eup %3147  ;;  %2463 = vst.msk [vmem:[%s5299_s2 + $0x78] sm:$0xff] %vm2447_vm0, %v2288_v49  ;;  %v2287_v58 = vmul.f32 %v1476_v53, %v1243_v44  ;;  %1795 = vperm.xlu0 %2801, %v3144_v48   ;;  %3167 = vpow2.f32 %v2716_v40  ;;  %v1251_v44 = vld [vmem:[%s5298_s1 + $0xb0] sm:$0xff] }
  0xbb   :  { %v3150_v61 = vpop.eup %3149  ;;  %v1491_v62 = vpop.permute.xlu1 %1490  ;;  %3169 = vpow2.f32 %v2719_v46 }
  0xbc   :  { %v3152_v2 = vpop.eup %3151  ;;  %2462 = vst.msk [vmem:[%s5299_s2 + $0x70] sm:$0xff] %vm2447_vm0, %v2287_v58  ;;  %v2290_v3 = vmul.f32 %v1491_v62, %v1246_v54  ;;  %1810 = vperm.xlu1 %2802, %v3146_v52   ;;  %3171 = vpow2.f32 %v2718_v50  ;;  %v1253_v58 = vld [vmem:[%s5298_s1 + $0xc0] sm:$0xff] }
  0xbd   :  { %v3154_v6 = vpop.eup %3153  ;;  %v1486_v7 = vpop.permute.xlu0 %1485  ;;  %3173 = vpow2.f32 %v2721_v55 }
  0xbe   :  { %v3156_v11 = vpop.eup %3155  ;;  %2465 = vst.msk [vmem:[%s5299_s2 + $0x88] sm:$0xff] %vm2447_vm0, %v2290_v3  ;;  %v2289_v12 = vmul.f32 %v1486_v7, %v1245_v63  ;;  %1805 = vperm.xlu0 %2801, %v3148_v57   ;;  %3175 = vpow2.f32 %v2720_v59  ;;  %v116_v3 = vld [vmem:[%s5297_s0 + $0x348] sm:$0xff]  ;;  %v115_v7 = vld [vmem:[%s5297_s0 + $0x340] sm:$0xff] }
  0xbf   :  { %v3158_v15 = vpop.eup %3157  ;;  %v1501_v16 = vpop.permute.xlu1 %1500  ;;  %3177 = vpow2.f32 %v2723_v0 }
  0xc0   :  { %v3160_v20 = vpop.eup %3159  ;;  %2464 = vst.msk [vmem:[%s5299_s2 + $0x80] sm:$0xff] %vm2447_vm0, %v2289_v12  ;;  %v2292_v21 = vmul.f32 %v1501_v16, %v1248_v8  ;;  %1820 = vperm.xlu1 %2802, %v3150_v61   ;;  %3179 = vpow2.f32 %v2722_v4  ;;  %v118_v12 = vld [vmem:[%s5297_s0 + $0x358] sm:$0xff]  ;;  %v2731_v16 = vmul.f32 -1.442695, %v116_v3 }
  0xc1   :  { %v3162_v23 = vpop.eup %3161  ;;  %v1496_v24 = vpop.permute.xlu0 %1495  ;;  %3181 = vpow2.f32 %v2725_v9 }
  0xc2   :  { %v3968_v27 = vpop.eup %3163  ;;  %2467 = vst.msk [vmem:[%s5299_s2 + $0x98] sm:$0xff] %vm2447_vm0, %v2292_v21  ;;  %v2291_v28 = vmul.f32 %v1496_v24, %v1247_v17  ;;  %1815 = vperm.xlu0 %2801, %v3152_v2   ;;  %3183 = vpow2.f32 %v2724_v13  ;;  %v117_v17 = vld [vmem:[%s5297_s0 + $0x350] sm:$0xff] }
  0xc3   :  { %v3974_v30 = vpop.eup %3165  ;;  %v1511_v31 = vpop.permute.xlu1 %1510  ;;  %3185 = vpow2.f32 %v2727_v18 }
  0xc4   :  { %v3168_v33 = vpop.eup %3167  ;;  %2466 = vst.msk [vmem:[%s5299_s2 + $0x90] sm:$0xff] %vm2447_vm0, %v2291_v28  ;;  %v2294_v34 = vmul.f32 %v1511_v31, %v1250_v25  ;;  %1830 = vperm.xlu1 %2802, %v3154_v6   ;;  %3187 = vpow2.f32 %v2726_v22  ;;  %v2730_v22 = vmul.f32 -1.442695, %v115_v7  ;;  %v2732_v31 = vmul.f32 -1.442695, %v117_v17 }
  0xc5   :  { %v3170_v35 = vpop.eup %3169  ;;  %v1506_v36 = vpop.permute.xlu0 %1505  ;;  %v797_v38 = vadd.f32 1.0, %v3168_v33  ;;  %3189 = vpow2.f32 %v2729_v26  ;;  %v2733_v26 = vmul.f32 -1.442695, %v118_v12 }
  0xc6   :  { %v3172_v39 = vpop.eup %3171  ;;  %2469 = vst.msk [vmem:[%s5299_s2 + $0xa8] sm:$0xff] %vm2447_vm0, %v2294_v34  ;;  %v2293_v40 = vmul.f32 %v1506_v36, %v1249_v32  ;;  %1825 = vperm.xlu0 %2801, %v3156_v11   ;;  %v800_v41 = vadd.f32 1.0, %v3170_v35  ;;  %3191 = vpow2.f32 %v2728_v29  ;;  %v122_v32 = vld [vmem:[%s5297_s0 + $0x378] sm:$0xff]  ;;  %v121_v36 = vld [vmem:[%s5297_s0 + $0x370] sm:$0xff] }
  0xc7   :  { %v3174_v42 = vpop.eup %3173  ;;  %v1521_v43 = vpop.permute.xlu1 %1520  ;;  %3193 = vrcp.f32 %v797_v38  ;;  %v799_v45 = vadd.f32 1.0, %v3172_v39  ;;  %v1260_v39 = vld [vmem:[%s5298_s1 + $0xf8] sm:$0xff] }
  0xc8   :  { %v3176_v46 = vpop.eup %3175  ;;  %2468 = vst.msk [vmem:[%s5299_s2 + $0xa0] sm:$0xff] %vm2447_vm0, %v2293_v40  ;;  %v2296_v47 = vmul.f32 %v1521_v43, %v1252_v37  ;;  %1840 = vperm.xlu1 %2802, %v3158_v15   ;;  %3195 = vrcp.f32 %v800_v41  ;;  %v802_v48 = vadd.f32 1.0, %v3174_v42  ;;  %v124_v41 = vld [vmem:[%s5297_s0 + $0x388] sm:$0xff] }
  0xc9   :  { %v3178_v49 = vpop.eup %3177  ;;  %v1516_v50 = vpop.permute.xlu0 %1515  ;;  %3197 = vrcp.f32 %v799_v45  ;;  %v801_v52 = vadd.f32 1.0, %v3176_v46  ;;  %v123_v45 = vld [vmem:[%s5297_s0 + $0x380] sm:$0xff] }
  0xca   :  { %v3180_v53 = vpop.eup %3179  ;;  %2471 = vst.msk [vmem:[%s5299_s2 + $0xb8] sm:$0xff] %vm2447_vm0, %v2296_v47  ;;  %v2295_v54 = vmul.f32 %v1516_v50, %v1251_v44  ;;  %1835 = vperm.xlu0 %2801, %v3160_v20   ;;  %3199 = vrcp.f32 %v802_v48  ;;  %v804_v55 = vadd.f32 1.0, %v3178_v49  ;;  %v1258_v20 = vld [vmem:[%s5298_s1 + $0xe8] sm:$0xff]  ;;  %v2737_v44 = vmul.f32 -1.442695, %v122_v32  ;;  %v1259_v48 = vld [vmem:[%s5298_s1 + $0xf0] sm:$0xff] }
  0xcb   :  { %v3182_v56 = vpop.eup %3181  ;;  %v1531_v57 = vpop.permute.xlu1 %1530  ;;  %3201 = vrcp.f32 %v801_v52  ;;  %v803_v59 = vadd.f32 1.0, %v3180_v53  ;;  %v2736_v49 = vmul.f32 -1.442695, %v121_v36  ;;  %v126_v50 = vld [vmem:[%s5297_s0 + $0x398] sm:$0xff]  ;;  %v2739_v53 = vmul.f32 -1.442695, %v124_v41 }
  0xcc   :  { %v3184_v60 = vpop.eup %3183  ;;  %2470 = vst.msk [vmem:[%s5299_s2 + $0xb0] sm:$0xff] %vm2447_vm0, %v2295_v54  ;;  %v2298_v61 = vmul.f32 %v1531_v57, %v1254_v51  ;;  %1850 = vperm.xlu1 %2802, %v3162_v23   ;;  %3203 = vrcp.f32 %v804_v55  ;;  %v806_v62 = vadd.f32 1.0, %v3182_v56  ;;  %v120_v23 = vld [vmem:[%s5297_s0 + $0x368] sm:$0xff]  ;;  %v125_v54 = vld [vmem:[%s5297_s0 + $0x390] sm:$0xff] }
  0xcd   :  { %v3186_v63 = vpop.eup %3185  ;;  %v1526_v0 = vpop.permute.xlu0 %1525  ;;  %3205 = vrcp.f32 %v803_v59  ;;  %v805_v2 = vadd.f32 1.0, %v3184_v60  ;;  %v2735_v35 = vmul.f32 -1.442695, %v120_v23  ;;  %v1262_v57 = vld [vmem:[%s5298_s1 + $0x108] sm:$0xff]  ;;  %v1267_v41 = vld [vmem:[%s5298_s1 + $0x130] sm:$0xff] }
  0xce   :  { %v3188_v4 = vpop.eup %3187  ;;  %2473 = vst.msk [vmem:[%s5299_s2 + $0xc8] sm:$0xff] %vm2447_vm0, %v2298_v61  ;;  %v2297_v5 = vmul.f32 %v1526_v0, %v1253_v58  ;;  %1845 = vperm.xlu0 %2801, %v3968_v27   ;;  %3207 = vrcp.f32 %v806_v62  ;;  %v808_v6 = vadd.f32 1.0, %v3186_v63  ;;  %v119_v27 = vld [vmem:[%s5297_s0 + $0x360] sm:$0xff]  ;;  %v2738_v58 = vmul.f32 -1.442695, %v123_v45  ;;  %v128_v59 = vld [vmem:[%s5297_s0 + $0x3a8] sm:$0xff] }
  0xcf   :  { %v3190_v8 = vpop.eup %3189  ;;  %v1541_v9 = vpop.permute.xlu1 %1540  ;;  %3209 = vrcp.f32 %v805_v2  ;;  %v807_v11 = vadd.f32 1.0, %v3188_v4  ;;  %v2734_v40 = vmul.f32 -1.442695, %v119_v27  ;;  %v2741_v62 = vmul.f32 -1.442695, %v126_v50  ;;  %v1265_v27 = vld [vmem:[%s5298_s1 + $0x120] sm:$0xff] }
  0xd0   :  { %v3192_v13 = vpop.eup %3191  ;;  %2472 = vst.msk [vmem:[%s5299_s2 + $0xc0] sm:$0xff] %vm2447_vm0, %v2297_v5  ;;  %v2300_v14 = vmul.f32 %v1541_v9, %v1256_v1  ;;  %1860 = vperm.xlu1 %2802, %v3974_v30   ;;  %3211 = vrcp.f32 %v808_v6  ;;  %v810_v15 = vadd.f32 1.0, %v3190_v8  ;;  %v1257_v30 = vld [vmem:[%s5298_s1 + $0xe0] sm:$0xff]  ;;  %v2740_v2 = vmul.f32 -1.442695, %v125_v54  ;;  %v1264_v8 = vld [vmem:[%s5298_s1 + $0x118] sm:$0xff] }
  0xd1   :  { %v3194_v18 = vpop.eup %3193  ;;  %v1536_v19 = vpop.permute.xlu0 %1535  ;;  %3213 = vrcp.f32 %v807_v11  ;;  %v809_v21 = vadd.f32 1.0, %v3192_v13  ;;  %v1261_v1 = vld [vmem:[%s5298_s1 + $0x100] sm:$0xff]  ;;  %v2743_v5 = vmul.f32 -1.442695, %v128_v59  ;;  %v1263_v13 = vld [vmem:[%s5298_s1 + $0x110] sm:$0xff]  ;;  %v1270_v50 = vld [vmem:[%s5298_s1 + $0x148] sm:$0xff] }
  0xd2   :  { %v3196_v24 = vpop.eup %3195  ;;  %2475 = vst.msk [vmem:[%s5299_s2 + $0xd8] sm:$0xff] %vm2447_vm0, %v2300_v14  ;;  %v2299_v25 = vmul.f32 %v1536_v19, %v1255_v10  ;;  %1855 = vperm.xlu0 %2801, %v3194_v18   ;;  %3215 = vrcp.f32 %v810_v15 }
  0xd3   :  { %v3198_v28 = vpop.eup %3197  ;;  %v1551_v29 = vpop.permute.xlu1 %1550  ;;  %3217 = vrcp.f32 %v809_v21 }
  0xd4   :  { %v3200_v33 = vpop.eup %3199  ;;  %2474 = vst.msk [vmem:[%s5299_s2 + $0xd0] sm:$0xff] %vm2447_vm0, %v2299_v25  ;;  %v2302_v34 = vmul.f32 %v1551_v29, %v1258_v20  ;;  %1870 = vperm.xlu1 %2802, %v3196_v24   ;;  %3219 = vpow2.f32 %v2731_v16  ;;  %v1266_v20 = vld [vmem:[%s5298_s1 + $0x128] sm:$0xff] }
  0xd5   :  { %v3202_v37 = vpop.eup %3201  ;;  %v1546_v38 = vpop.permute.xlu0 %1545  ;;  %3221 = vpow2.f32 %v2730_v22 }
  0xd6   :  { %v3204_v42 = vpop.eup %3203  ;;  %2477 = vst.msk [vmem:[%s5299_s2 + $0xe8] sm:$0xff] %vm2447_vm0, %v2302_v34  ;;  %v2301_v43 = vmul.f32 %v1546_v38, %v1257_v30  ;;  %1865 = vperm.xlu0 %2801, %v3198_v28   ;;  %3223 = vpow2.f32 %v2733_v26  ;;  %v1268_v34 = vld [vmem:[%s5298_s1 + $0x138] sm:$0xff] }
  0xd7   :  { %v3206_v46 = vpop.eup %3205  ;;  %v1561_v47 = vpop.permute.xlu1 %1560  ;;  %3225 = vpow2.f32 %v2732_v31 }
  0xd8   :  { %v3208_v51 = vpop.eup %3207  ;;  %2476 = vst.msk [vmem:[%s5299_s2 + $0xe0] sm:$0xff] %vm2447_vm0, %v2301_v43  ;;  %v2304_v52 = vmul.f32 %v1561_v47, %v1260_v39  ;;  %1880 = vperm.xlu1 %2802, %v3200_v33   ;;  %3227 = vpow2.f32 %v2735_v35  ;;  %v127_v43 = vld [vmem:[%s5297_s0 + $0x3a0] sm:$0xff]  ;;  %v130_v47 = vld [vmem:[%s5297_s0 + $0x3b8] sm:$0xff] }
  0xd9   :  { %v3210_v55 = vpop.eup %3209  ;;  %v1556_v56 = vpop.permute.xlu0 %1555  ;;  %3229 = vpow2.f32 %v2734_v40 }
  0xda   :  { %v3212_v60 = vpop.eup %3211  ;;  %2479 = vst.msk [vmem:[%s5299_s2 + $0xf8] sm:$0xff] %vm2447_vm0, %v2304_v52  ;;  %v2303_v61 = vmul.f32 %v1556_v56, %v1259_v48  ;;  %1875 = vperm.xlu0 %2801, %v3202_v37   ;;  %3231 = vpow2.f32 %v2737_v44  ;;  %v129_v52 = vld [vmem:[%s5297_s0 + $0x3b0] sm:$0xff]  ;;  %v2742_v56 = vmul.f32 -1.442695, %v127_v43 }
  0xdb   :  { %v3214_v63 = vpop.eup %3213  ;;  %v1571_v0 = vpop.permute.xlu1 %1570  ;;  %3233 = vpow2.f32 %v2736_v49 }
  0xdc   :  { %v4104_v3 = vpop.eup %3215  ;;  %2478 = vst.msk [vmem:[%s5299_s2 + $0xf0] sm:$0xff] %vm2447_vm0, %v2303_v61  ;;  %v2306_v4 = vmul.f32 %v1571_v0, %v1262_v57  ;;  %1890 = vperm.xlu1 %2802, %v3204_v42   ;;  %3235 = vpow2.f32 %v2739_v53  ;;  %v132_v57 = vld [vmem:[%s5297_s0 + $0x3c8] sm:$0xff] }
  0xdd   :  { %v4110_v6 = vpop.eup %3217  ;;  %v1566_v7 = vpop.permute.xlu0 %1565  ;;  %3237 = vpow2.f32 %v2738_v58 }
  0xde   :  { %v3220_v9 = vpop.eup %3219  ;;  %2481 = vst.msk [vmem:[%s5299_s2 + $0x108] sm:$0xff] %vm2447_vm0, %v2306_v4  ;;  %v2305_v10 = vmul.f32 %v1566_v7, %v1261_v1  ;;  %1885 = vperm.xlu0 %2801, %v3206_v46   ;;  %3239 = vpow2.f32 %v2741_v62  ;;  %v2745_v62 = vmul.f32 -1.442695, %v130_v47  ;;  %v2747_v7 = vmul.f32 -1.442695, %v132_v57 }
  0xdf   :  { %v3222_v11 = vpop.eup %3221  ;;  %v1581_v12 = vpop.permute.xlu1 %1580  ;;  %v812_v14 = vadd.f32 1.0, %v3220_v9  ;;  %3241 = vpow2.f32 %v2740_v2  ;;  %v2744_v2 = vmul.f32 -1.442695, %v129_v52 }
  0xe0   :  { %v3224_v15 = vpop.eup %3223  ;;  %2480 = vst.msk [vmem:[%s5299_s2 + $0x100] sm:$0xff] %vm2447_vm0, %v2305_v10  ;;  %v2308_v16 = vmul.f32 %v1581_v12, %v1264_v8  ;;  %1900 = vperm.xlu1 %2802, %v3208_v51   ;;  %v811_v17 = vadd.f32 1.0, %v3222_v11  ;;  %3243 = vpow2.f32 %v2743_v5  ;;  %v133_v8 = vld [vmem:[%s5297_s0 + $0x3d0] sm:$0xff]  ;;  %v136_v12 = vld [vmem:[%s5297_s0 + $0x3e8] sm:$0xff] }
  0xe1   :  { %v3226_v18 = vpop.eup %3225  ;;  %v1576_v19 = vpop.permute.xlu0 %1575  ;;  %3245 = vrcp.f32 %v812_v14  ;;  %v814_v21 = vadd.f32 1.0, %v3224_v15  ;;  %v1271_v15 = vld [vmem:[%s5298_s1 + $0x150] sm:$0xff] }
  0xe2   :  { %v3228_v22 = vpop.eup %3227  ;;  %2483 = vst.msk [vmem:[%s5299_s2 + $0x118] sm:$0xff] %vm2447_vm0, %v2308_v16  ;;  %v2307_v23 = vmul.f32 %v1576_v19, %v1263_v13  ;;  %1895 = vperm.xlu0 %2801, %v3210_v55   ;;  %3247 = vrcp.f32 %v811_v17  ;;  %v813_v24 = vadd.f32 1.0, %v3226_v18  ;;  %v135_v17 = vld [vmem:[%s5297_s0 + $0x3e0] sm:$0xff] }
  0xe3   :  { %v3230_v25 = vpop.eup %3229  ;;  %v1591_v26 = vpop.permute.xlu1 %1590  ;;  %3249 = vrcp.f32 %v814_v21  ;;  %v816_v28 = vadd.f32 1.0, %v3228_v22  ;;  %v138_v21 = vld [vmem:[%s5297_s0 + $0x3f8] sm:$0xff] }
  0xe4   :  { %v3232_v29 = vpop.eup %3231  ;;  %2482 = vst.msk [vmem:[%s5299_s2 + $0x110] sm:$0xff] %vm2447_vm0, %v2307_v23  ;;  %v2310_v30 = vmul.f32 %v1591_v26, %v1266_v20  ;;  %1910 = vperm.xlu1 %2802, %v3212_v60   ;;  %3251 = vrcp.f32 %v813_v24  ;;  %v815_v31 = vadd.f32 1.0, %v3230_v25  ;;  %v1269_v60 = vld [vmem:[%s5298_s1 + $0x140] sm:$0xff]  ;;  %v2748_v20 = vmul.f32 -1.442695, %v133_v8  ;;  %v1274_v24 = vld [vmem:[%s5298_s1 + $0x168] sm:$0xff] }
  0xe5   :  { %v3234_v32 = vpop.eup %3233  ;;  %v1586_v33 = vpop.permute.xlu0 %1585  ;;  %3253 = vrcp.f32 %v816_v28  ;;  %v818_v35 = vadd.f32 1.0, %v3232_v29  ;;  %v2751_v25 = vmul.f32 -1.442695, %v136_v12  ;;  %v137_v26 = vld [vmem:[%s5297_s0 + $0x3f0] sm:$0xff]  ;;  %v2750_v29 = vmul.f32 -1.442695, %v135_v17 }
  0xe6   :  { %v3236_v36 = vpop.eup %3235  ;;  %2485 = vst.msk [vmem:[%s5299_s2 + $0x128] sm:$0xff] %vm2447_vm0, %v2310_v30  ;;  %v2309_v37 = vmul.f32 %v1586_v33, %v1265_v27  ;;  %1905 = vperm.xlu0 %2801, %v3214_v63   ;;  %3255 = vrcp.f32 %v815_v31  ;;  %v817_v38 = vadd.f32 1.0, %v3234_v32  ;;  %v131_v63 = vld [vmem:[%s5297_s0 + $0x3c0] sm:$0xff]  ;;  %v140_v30 = vld [vmem:[%s5297_s0 + $0x408] sm:$0xff] }
  0xe7   :  { %v3238_v39 = vpop.eup %3237  ;;  %v1601_v40 = vpop.permute.xlu1 %1600  ;;  %3257 = vrcp.f32 %v818_v35  ;;  %v820_v42 = vadd.f32 1.0, %v3236_v36  ;;  %v2746_v11 = vmul.f32 -1.442695, %v131_v63  ;;  %v1273_v33 = vld [vmem:[%s5298_s1 + $0x160] sm:$0xff]  ;;  %v1282_v17 = vld [vmem:[%s5298_s1 + $0x1a8] sm:$0xff] }
  0xe8   :  { %v3240_v44 = vpop.eup %3239  ;;  %2484 = vst.msk [vmem:[%s5299_s2 + $0x120] sm:$0xff] %vm2447_vm0, %v2309_v37  ;;  %v2312_v45 = vmul.f32 %v1601_v40, %v1268_v34  ;;  %1920 = vperm.xlu1 %2802, %v4104_v3   ;;  %3259 = vrcp.f32 %v817_v38  ;;  %v819_v46 = vadd.f32 1.0, %v3238_v39  ;;  %v134_v3 = vld [vmem:[%s5297_s0 + $0x3d8] sm:$0xff]  ;;  %v2753_v34 = vmul.f32 -1.442695, %v138_v21  ;;  %v139_v35 = vld [vmem:[%s5297_s0 + $0x400] sm:$0xff] }
  0xe9   :  { %v3242_v48 = vpop.eup %3241  ;;  %v1596_v49 = vpop.permute.xlu0 %1595  ;;  %3261 = vrcp.f32 %v820_v42  ;;  %v822_v51 = vadd.f32 1.0, %v3240_v44  ;;  %v2749_v16 = vmul.f32 -1.442695, %v134_v3  ;;  %v2752_v38 = vmul.f32 -1.442695, %v137_v26  ;;  %v1280_v3 = vld [vmem:[%s5298_s1 + $0x198] sm:$0xff] }
  0xea   :  { %v3244_v53 = vpop.eup %3243  ;;  %2487 = vst.msk [vmem:[%s5299_s2 + $0x138] sm:$0xff] %vm2447_vm0, %v2312_v45  ;;  %v2311_v54 = vmul.f32 %v1596_v49, %v1267_v41  ;;  %1915 = vperm.xlu0 %2801, %v4110_v6   ;;  %3263 = vrcp.f32 %v819_v46  ;;  %v821_v55 = vadd.f32 1.0, %v3242_v48  ;;  %v1272_v6 = vld [vmem:[%s5298_s1 + $0x158] sm:$0xff]  ;;  %v2755_v42 = vmul.f32 -1.442695, %v140_v30  ;;  %v1275_v48 = vld [vmem:[%s5298_s1 + $0x170] sm:$0xff] }
  0xeb   :  { %v3246_v58 = vpop.eup %3245  ;;  %v1611_v59 = vpop.permute.xlu1 %1610  ;;  %3265 = vrcp.f32 %v822_v51  ;;  %v824_v61 = vadd.f32 1.0, %v3244_v53  ;;  %v1276_v41 = vld [vmem:[%s5298_s1 + $0x178] sm:$0xff]  ;;  %v2754_v45 = vmul.f32 -1.442695, %v139_v35  ;;  %v1278_v53 = vld [vmem:[%s5298_s1 + $0x188] sm:$0xff]  ;;  %v1281_v26 = vld [vmem:[%s5298_s1 + $0x1a0] sm:$0xff] }
  0xec   :  { %v3248_v0 = vpop.eup %3247  ;;  %2486 = vst.msk [vmem:[%s5299_s2 + $0x130] sm:$0xff] %vm2447_vm0, %v2311_v54  ;;  %v2314_v1 = vmul.f32 %v1611_v59, %v1270_v50  ;;  %1930 = vperm.xlu1 %2802, %v3246_v58   ;;  %3267 = vrcp.f32 %v821_v55 }
  0xed   :  { %v3250_v4 = vpop.eup %3249  ;;  %v1606_v5 = vpop.permute.xlu0 %1605  ;;  %3269 = vrcp.f32 %v824_v61 }
  0xee   :  { %v3252_v9 = vpop.eup %3251  ;;  %2489 = vst.msk [vmem:[%s5299_s2 + $0x148] sm:$0xff] %vm2447_vm0, %v2314_v1  ;;  %v2313_v10 = vmul.f32 %v1606_v5, %v1269_v60  ;;  %1925 = vperm.xlu0 %2801, %v3248_v0   ;;  %3271 = vpow2.f32 %v2742_v56  ;;  %v1277_v60 = vld [vmem:[%s5298_s1 + $0x180] sm:$0xff] }
  0xef   :  { %v3254_v13 = vpop.eup %3253  ;;  %v1621_v14 = vpop.permute.xlu1 %1620  ;;  %3273 = vpow2.f32 %v2745_v62 }
  0xf0   :  { %v3256_v18 = vpop.eup %3255  ;;  %2488 = vst.msk [vmem:[%s5299_s2 + $0x140] sm:$0xff] %vm2447_vm0, %v2313_v10  ;;  %v2316_v19 = vmul.f32 %v1621_v14, %v1272_v6  ;;  %1940 = vperm.xlu1 %2802, %v3250_v4   ;;  %3275 = vpow2.f32 %v2744_v2  ;;  %v1279_v10 = vld [vmem:[%s5298_s1 + $0x190] sm:$0xff] }
  0xf1   :  { %v3258_v22 = vpop.eup %3257  ;;  %v1616_v23 = vpop.permute.xlu0 %1615  ;;  %3277 = vpow2.f32 %v2747_v7 }
  0xf2   :  { %v3260_v27 = vpop.eup %3259  ;;  %2491 = vst.msk [vmem:[%s5299_s2 + $0x158] sm:$0xff] %vm2447_vm0, %v2316_v19  ;;  %v2315_v28 = vmul.f32 %v1616_v23, %v1271_v15  ;;  %1935 = vperm.xlu0 %2801, %v3252_v9   ;;  %3279 = vpow2.f32 %v2746_v11  ;;  %v142_v19 = vld [vmem:[%s5297_s0 + $0x418] sm:$0xff]  ;;  %v141_v23 = vld [vmem:[%s5297_s0 + $0x410] sm:$0xff] }
  0xf3   :  { %v3262_v31 = vpop.eup %3261  ;;  %v1631_v32 = vpop.permute.xlu1 %1630  ;;  %3281 = vpow2.f32 %v2749_v16 }
  0xf4   :  { %v3264_v36 = vpop.eup %3263  ;;  %2490 = vst.msk [vmem:[%s5299_s2 + $0x150] sm:$0xff] %vm2447_vm0, %v2315_v28  ;;  %v2318_v37 = vmul.f32 %v1631_v32, %v1274_v24  ;;  %1950 = vperm.xlu1 %2802, %v3254_v13   ;;  %3283 = vpow2.f32 %v2748_v20  ;;  %v144_v28 = vld [vmem:[%s5297_s0 + $0x428] sm:$0xff]  ;;  %v2757_v32 = vmul.f32 -1.442695, %v142_v19 }
  0xf5   :  { %v3266_v39 = vpop.eup %3265  ;;  %v1626_v40 = vpop.permute.xlu0 %1625  ;;  %3285 = vpow2.f32 %v2751_v25 }
  0xf6   :  { %v4240_v43 = vpop.eup %3267  ;;  %2493 = vst.msk [vmem:[%s5299_s2 + $0x168] sm:$0xff] %vm2447_vm0, %v2318_v37  ;;  %v2317_v44 = vmul.f32 %v1626_v40, %v1273_v33  ;;  %1945 = vperm.xlu0 %2801, %v3256_v18   ;;  %3287 = vpow2.f32 %v2750_v29  ;;  %v143_v33 = vld [vmem:[%s5297_s0 + $0x420] sm:$0xff] }
  0xf7   :  { %v4246_v46 = vpop.eup %3269  ;;  %v1641_v47 = vpop.permute.xlu1 %1640  ;;  %3289 = vpow2.f32 %v2753_v34 }
  0xf8   :  { %v3272_v49 = vpop.eup %3271  ;;  %2492 = vst.msk [vmem:[%s5299_s2 + $0x160] sm:$0xff] %vm2447_vm0, %v2317_v44  ;;  %v2320_v50 = vmul.f32 %v1641_v47, %v1276_v41  ;;  %1960 = vperm.xlu1 %2802, %v3258_v22   ;;  %3291 = vpow2.f32 %v2752_v38  ;;  %v2756_v38 = vmul.f32 -1.442695, %v141_v23  ;;  %v2758_v47 = vmul.f32 -1.442695, %v143_v33 }
  0xf9   :  { %v3274_v51 = vpop.eup %3273  ;;  %v1636_v52 = vpop.permute.xlu0 %1635  ;;  %v823_v54 = vadd.f32 1.0, %v3272_v49  ;;  %3293 = vpow2.f32 %v2755_v42  ;;  %v2759_v42 = vmul.f32 -1.442695, %v144_v28 }
  0xfa   :  { %v3276_v55 = vpop.eup %3275  ;;  %2495 = vst.msk [vmem:[%s5299_s2 + $0x178] sm:$0xff] %vm2447_vm0, %v2320_v50  ;;  %v2319_v56 = vmul.f32 %v1636_v52, %v1275_v48  ;;  %1955 = vperm.xlu0 %2801, %v3260_v27   ;;  %v826_v57 = vadd.f32 1.0, %v3274_v51  ;;  %3295 = vpow2.f32 %v2754_v45  ;;  %v148_v48 = vld [vmem:[%s5297_s0 + $0x448] sm:$0xff]  ;;  %v147_v52 = vld [vmem:[%s5297_s0 + $0x440] sm:$0xff] }
  0xfb   :  { %v3278_v58 = vpop.eup %3277  ;;  %v1651_v59 = vpop.permute.xlu1 %1650  ;;  %3297 = vrcp.f32 %v823_v54  ;;  %v825_v61 = vadd.f32 1.0, %v3276_v55  ;;  %v1286_v55 = vld [vmem:[%s5298_s1 + $0x1c8] sm:$0xff] }
  0xfc   :  { %v3280_v62 = vpop.eup %3279  ;;  %2494 = vst.msk [vmem:[%s5299_s2 + $0x170] sm:$0xff] %vm2447_vm0, %v2319_v56  ;;  %v2322_v63 = vmul.f32 %v1651_v59, %v1278_v53  ;;  %1970 = vperm.xlu1 %2802, %v3262_v31   ;;  %3299 = vrcp.f32 %v826_v57  ;;  %v828_v0 = vadd.f32 1.0, %v3278_v58  ;;  %v150_v57 = vld [vmem:[%s5297_s0 + $0x458] sm:$0xff] }
  0xfd   :  { %v3282_v1 = vpop.eup %3281  ;;  %v1646_v2 = vpop.permute.xlu0 %1645  ;;  %3301 = vrcp.f32 %v825_v61  ;;  %v827_v4 = vadd.f32 1.0, %v3280_v62  ;;  %v149_v61 = vld [vmem:[%s5297_s0 + $0x450] sm:$0xff] }
  0xfe   :  { %v3284_v5 = vpop.eup %3283  ;;  %2497 = vst.msk [vmem:[%s5299_s2 + $0x188] sm:$0xff] %vm2447_vm0, %v2322_v63  ;;  %v2321_v6 = vmul.f32 %v1646_v2, %v1277_v60  ;;  %1965 = vperm.xlu0 %2801, %v3264_v36   ;;  %3303 = vrcp.f32 %v828_v0  ;;  %v830_v7 = vadd.f32 1.0, %v3282_v1  ;;  %v1284_v36 = vld [vmem:[%s5298_s1 + $0x1b8] sm:$0xff]  ;;  %v2763_v60 = vmul.f32 -1.442695, %v148_v48  ;;  %v1285_v0 = vld [vmem:[%s5298_s1 + $0x1c0] sm:$0xff] }
  0xff   :  { %v3286_v8 = vpop.eup %3285  ;;  %v1661_v9 = vpop.permute.xlu1 %1660  ;;  %3305 = vrcp.f32 %v827_v4  ;;  %v829_v11 = vadd.f32 1.0, %v3284_v5  ;;  %v2762_v1 = vmul.f32 -1.442695, %v147_v52  ;;  %v152_v2 = vld [vmem:[%s5297_s0 + $0x468] sm:$0xff]  ;;  %v2765_v5 = vmul.f32 -1.442695, %v150_v57 }
 0x100   :  { %v3288_v12 = vpop.eup %3287  ;;  %2496 = vst.msk [vmem:[%s5299_s2 + $0x180] sm:$0xff] %vm2447_vm0, %v2321_v6  ;;  %v2324_v13 = vmul.f32 %v1661_v9, %v1280_v3  ;;  %1980 = vperm.xlu1 %2802, %v3266_v39   ;;  %3307 = vrcp.f32 %v830_v7  ;;  %v832_v14 = vadd.f32 1.0, %v3286_v8  ;;  %v146_v39 = vld [vmem:[%s5297_s0 + $0x438] sm:$0xff]  ;;  %v151_v6 = vld [vmem:[%s5297_s0 + $0x460] sm:$0xff] }
 0x101   :  { %v3290_v15 = vpop.eup %3289  ;;  %v1656_v16 = vpop.permute.xlu0 %1655  ;;  %3309 = vrcp.f32 %v829_v11  ;;  %v831_v18 = vadd.f32 1.0, %v3288_v12  ;;  %v2761_v51 = vmul.f32 -1.442695, %v146_v39  ;;  %v1288_v9 = vld [vmem:[%s5298_s1 + $0x1d8] sm:$0xff]  ;;  %v1293_v57 = vld [vmem:[%s5298_s1 + $0x200] sm:$0xff] }
 0x102   :  { %v3292_v20 = vpop.eup %3291  ;;  %2499 = vst.msk [vmem:[%s5299_s2 + $0x198] sm:$0xff] %vm2447_vm0, %v2324_v13  ;;  %v2323_v21 = vmul.f32 %v1656_v16, %v1279_v10  ;;  %1975 = vperm.xlu0 %2801, %v4240_v43   ;;  %3311 = vrcp.f32 %v832_v14  ;;  %v834_v22 = vadd.f32 1.0, %v3290_v15  ;;  %v145_v43 = vld [vmem:[%s5297_s0 + $0x430] sm:$0xff]  ;;  %v2764_v10 = vmul.f32 -1.442695, %v149_v61  ;;  %v154_v11 = vld [vmem:[%s5297_s0 + $0x478] sm:$0xff] }
 0x103   :  { %v3294_v24 = vpop.eup %3293  ;;  %v1671_v25 = vpop.permute.xlu1 %1670  ;;  %3313 = vrcp.f32 %v831_v18  ;;  %v833_v27 = vadd.f32 1.0, %v3292_v20  ;;  %v2760_v56 = vmul.f32 -1.442695, %v145_v43  ;;  %v2767_v14 = vmul.f32 -1.442695, %v152_v2  ;;  %v1291_v43 = vld [vmem:[%s5298_s1 + $0x1f0] sm:$0xff] }
 0x104   :  { %v3296_v29 = vpop.eup %3295  ;;  %2498 = vst.msk [vmem:[%s5299_s2 + $0x190] sm:$0xff] %vm2447_vm0, %v2323_v21  ;;  %v2326_v30 = vmul.f32 %v1671_v25, %v1282_v17  ;;  %1990 = vperm.xlu1 %2802, %v4246_v46   ;;  %3315 = vrcp.f32 %v834_v22  ;;  %v836_v31 = vadd.f32 1.0, %v3294_v24  ;;  %v1283_v46 = vld [vmem:[%s5298_s1 + $0x1b0] sm:$0xff]  ;;  %v2766_v18 = vmul.f32 -1.442695, %v151_v6  ;;  %v1290_v24 = vld [vmem:[%s5298_s1 + $0x1e8] sm:$0xff] }
 0x105   :  { %v3298_v34 = vpop.eup %3297  ;;  %v1666_v35 = vpop.permute.xlu0 %1665  ;;  %3317 = vrcp.f32 %v833_v27  ;;  %v835_v37 = vadd.f32 1.0, %v3296_v29  ;;  %v1287_v17 = vld [vmem:[%s5298_s1 + $0x1d0] sm:$0xff]  ;;  %v2769_v21 = vmul.f32 -1.442695, %v154_v11  ;;  %v1289_v29 = vld [vmem:[%s5298_s1 + $0x1e0] sm:$0xff]  ;;  %v1296_v2 = vld [vmem:[%s5298_s1 + $0x218] sm:$0xff] }
 0x106   :  { %v3300_v40 = vpop.eup %3299  ;;  %2501 = vst.msk [vmem:[%s5299_s2 + $0x1a8] sm:$0xff] %vm2447_vm0, %v2326_v30  ;;  %v2325_v41 = vmul.f32 %v1666_v35, %v1281_v26  ;;  %1985 = vperm.xlu0 %2801, %v3298_v34   ;;  %3319 = vrcp.f32 %v836_v31 }
 0x107   :  { %v3302_v44 = vpop.eup %3301  ;;  %v1681_v45 = vpop.permute.xlu1 %1680  ;;  %3321 = vrcp.f32 %v835_v37 }
 0x108   :  { %v3304_v49 = vpop.eup %3303  ;;  %2500 = vst.msk [vmem:[%s5299_s2 + $0x1a0] sm:$0xff] %vm2447_vm0, %v2325_v41  ;;  %v2328_v50 = vmul.f32 %v1681_v45, %v1284_v36  ;;  %2000 = vperm.xlu1 %2802, %v3300_v40   ;;  %3323 = vpow2.f32 %v2757_v32  ;;  %v1292_v36 = vld [vmem:[%s5298_s1 + $0x1f8] sm:$0xff] }
 0x109   :  { %v3306_v53 = vpop.eup %3305  ;;  %v1676_v54 = vpop.permute.xlu0 %1675  ;;  %3325 = vpow2.f32 %v2756_v38 }
 0x10a   :  { %v3308_v58 = vpop.eup %3307  ;;  %2503 = vst.msk [vmem:[%s5299_s2 + $0x1b8] sm:$0xff] %vm2447_vm0, %v2328_v50  ;;  %v2327_v59 = vmul.f32 %v1676_v54, %v1283_v46  ;;  %1995 = vperm.xlu0 %2801, %v3302_v44   ;;  %3327 = vpow2.f32 %v2759_v42  ;;  %v1294_v50 = vld [vmem:[%s5298_s1 + $0x208] sm:$0xff] }
 0x10b   :  { %v3310_v62 = vpop.eup %3309  ;;  %v1691_v63 = vpop.permute.xlu1 %1690  ;;  %3329 = vpow2.f32 %v2758_v47 }
 0x10c   :  { %v3312_v3 = vpop.eup %3311  ;;  %2502 = vst.msk [vmem:[%s5299_s2 + $0x1b0] sm:$0xff] %vm2447_vm0, %v2327_v59  ;;  %v2330_v4 = vmul.f32 %v1691_v63, %v1286_v55  ;;  %2010 = vperm.xlu1 %2802, %v3304_v49   ;;  %3331 = vpow2.f32 %v2761_v51  ;;  %v153_v59 = vld [vmem:[%s5297_s0 + $0x470] sm:$0xff]  ;;  %v156_v63 = vld [vmem:[%s5297_s0 + $0x488] sm:$0xff] }
 0x10d   :  { %v3314_v7 = vpop.eup %3313  ;;  %v1686_v8 = vpop.permute.xlu0 %1685  ;;  %3333 = vpow2.f32 %v2760_v56 }
 0x10e   :  { %v3316_v12 = vpop.eup %3315  ;;  %2505 = vst.msk [vmem:[%s5299_s2 + $0x1c8] sm:$0xff] %vm2447_vm0, %v2330_v4  ;;  %v2329_v13 = vmul.f32 %v1686_v8, %v1285_v0  ;;  %2005 = vperm.xlu0 %2801, %v3306_v53   ;;  %3335 = vpow2.f32 %v2763_v60  ;;  %v155_v4 = vld [vmem:[%s5297_s0 + $0x480] sm:$0xff]  ;;  %v2768_v8 = vmul.f32 -1.442695, %v153_v59 }
 0x10f   :  { %v3318_v15 = vpop.eup %3317  ;;  %v1701_v16 = vpop.permute.xlu1 %1700  ;;  %3337 = vpow2.f32 %v2762_v1 }
 0x110   :  { %v4376_v19 = vpop.eup %3319  ;;  %2504 = vst.msk [vmem:[%s5299_s2 + $0x1c0] sm:$0xff] %vm2447_vm0, %v2329_v13  ;;  %v2332_v20 = vmul.f32 %v1701_v16, %v1288_v9  ;;  %2020 = vperm.xlu1 %2802, %v3308_v58   ;;  %3339 = vpow2.f32 %v2765_v5  ;;  %v158_v9 = vld [vmem:[%s5297_s0 + $0x498] sm:$0xff] }
 0x111   :  { %v4382_v22 = vpop.eup %3321  ;;  %v1696_v23 = vpop.permute.xlu0 %1695  ;;  %3341 = vpow2.f32 %v2764_v10 }
 0x112   :  { %v3324_v25 = vpop.eup %3323  ;;  %2507 = vst.msk [vmem:[%s5299_s2 + $0x1d8] sm:$0xff] %vm2447_vm0, %v2332_v20  ;;  %v2331_v26 = vmul.f32 %v1696_v23, %v1287_v17  ;;  %2015 = vperm.xlu0 %2801, %v3310_v62   ;;  %3343 = vpow2.f32 %v2767_v14  ;;  %v2771_v14 = vmul.f32 -1.442695, %v156_v63  ;;  %v2773_v23 = vmul.f32 -1.442695, %v158_v9 }
 0x113   :  { %v3326_v27 = vpop.eup %3325  ;;  %v1711_v28 = vpop.permute.xlu1 %1710  ;;  %v838_v30 = vadd.f32 1.0, %v3324_v25  ;;  %3345 = vpow2.f32 %v2766_v18  ;;  %v2770_v18 = vmul.f32 -1.442695, %v155_v4 }
 0x114   :  { %v3328_v31 = vpop.eup %3327  ;;  %2506 = vst.msk [vmem:[%s5299_s2 + $0x1d0] sm:$0xff] %vm2447_vm0, %v2331_v26  ;;  %v2334_v32 = vmul.f32 %v1711_v28, %v1290_v24  ;;  %2030 = vperm.xlu1 %2802, %v3312_v3   ;;  %v837_v33 = vadd.f32 1.0, %v3326_v27  ;;  %3347 = vpow2.f32 %v2769_v21  ;;  %v159_v24 = vld [vmem:[%s5297_s0 + $0x4a0] sm:$0xff]  ;;  %v162_v28 = vld [vmem:[%s5297_s0 + $0x4b8] sm:$0xff] }
 0x115   :  { %v3330_v34 = vpop.eup %3329  ;;  %v1706_v35 = vpop.permute.xlu0 %1705  ;;  %3349 = vrcp.f32 %v838_v30  ;;  %v840_v37 = vadd.f32 1.0, %v3328_v31  ;;  %v1297_v31 = vld [vmem:[%s5298_s1 + $0x220] sm:$0xff] }
 0x116   :  { %v3332_v38 = vpop.eup %3331  ;;  %2509 = vst.msk [vmem:[%s5299_s2 + $0x1e8] sm:$0xff] %vm2447_vm0, %v2334_v32  ;;  %v2333_v39 = vmul.f32 %v1706_v35, %v1289_v29  ;;  %2025 = vperm.xlu0 %2801, %v3314_v7   ;;  %3351 = vrcp.f32 %v837_v33  ;;  %v839_v40 = vadd.f32 1.0, %v3330_v34  ;;  %v161_v33 = vld [vmem:[%s5297_s0 + $0x4b0] sm:$0xff] }
 0x117   :  { %v3334_v41 = vpop.eup %3333  ;;  %v1721_v42 = vpop.permute.xlu1 %1720  ;;  %3353 = vrcp.f32 %v840_v37  ;;  %v842_v44 = vadd.f32 1.0, %v3332_v38  ;;  %v164_v37 = vld [vmem:[%s5297_s0 + $0x4c8] sm:$0xff] }
 0x118   :  { %v3336_v45 = vpop.eup %3335  ;;  %2508 = vst.msk [vmem:[%s5299_s2 + $0x1e0] sm:$0xff] %vm2447_vm0, %v2333_v39  ;;  %v2336_v46 = vmul.f32 %v1721_v42, %v1292_v36  ;;  %2040 = vperm.xlu1 %2802, %v3316_v12   ;;  %3355 = vrcp.f32 %v839_v40  ;;  %v841_v47 = vadd.f32 1.0, %v3334_v41  ;;  %v1295_v12 = vld [vmem:[%s5298_s1 + $0x210] sm:$0xff]  ;;  %v2774_v36 = vmul.f32 -1.442695, %v159_v24  ;;  %v1300_v40 = vld [vmem:[%s5298_s1 + $0x238] sm:$0xff] }
 0x119   :  { %v3338_v48 = vpop.eup %3337  ;;  %v1716_v49 = vpop.permute.xlu0 %1715  ;;  %3357 = vrcp.f32 %v842_v44  ;;  %v844_v51 = vadd.f32 1.0, %v3336_v45  ;;  %v2777_v41 = vmul.f32 -1.442695, %v162_v28  ;;  %v163_v42 = vld [vmem:[%s5297_s0 + $0x4c0] sm:$0xff]  ;;  %v2776_v45 = vmul.f32 -1.442695, %v161_v33 }
 0x11a   :  { %v3340_v52 = vpop.eup %3339  ;;  %2511 = vst.msk [vmem:[%s5299_s2 + $0x1f8] sm:$0xff] %vm2447_vm0, %v2336_v46  ;;  %v2335_v53 = vmul.f32 %v1716_v49, %v1291_v43  ;;  %2035 = vperm.xlu0 %2801, %v3318_v15   ;;  %3359 = vrcp.f32 %v841_v47  ;;  %v843_v54 = vadd.f32 1.0, %v3338_v48  ;;  %v157_v15 = vld [vmem:[%s5297_s0 + $0x490] sm:$0xff]  ;;  %v166_v46 = vld [vmem:[%s5297_s0 + $0x4d8] sm:$0xff] }
 0x11b   :  { %v3342_v55 = vpop.eup %3341  ;;  %v1731_v56 = vpop.permute.xlu1 %1730  ;;  %3361 = vrcp.f32 %v844_v51  ;;  %v846_v58 = vadd.f32 1.0, %v3340_v52  ;;  %v2772_v27 = vmul.f32 -1.442695, %v157_v15  ;;  %v1299_v49 = vld [vmem:[%s5298_s1 + $0x230] sm:$0xff]  ;;  %v1308_v33 = vld [vmem:[%s5298_s1 + $0x278] sm:$0xff] }
 0x11c   :  { %v3344_v60 = vpop.eup %3343  ;;  %2510 = vst.msk [vmem:[%s5299_s2 + $0x1f0] sm:$0xff] %vm2447_vm0, %v2335_v53  ;;  %v2338_v61 = vmul.f32 %v1731_v56, %v1294_v50  ;;  %2050 = vperm.xlu1 %2802, %v4376_v19   ;;  %3363 = vrcp.f32 %v843_v54  ;;  %v845_v62 = vadd.f32 1.0, %v3342_v55  ;;  %v160_v19 = vld [vmem:[%s5297_s0 + $0x4a8] sm:$0xff]  ;;  %v2779_v50 = vmul.f32 -1.442695, %v164_v37  ;;  %v165_v51 = vld [vmem:[%s5297_s0 + $0x4d0] sm:$0xff] }
 0x11d   :  { %v3346_v0 = vpop.eup %3345  ;;  %v1726_v1 = vpop.permute.xlu0 %1725  ;;  %3365 = vrcp.f32 %v846_v58  ;;  %v848_v3 = vadd.f32 1.0, %v3344_v60  ;;  %v2775_v32 = vmul.f32 -1.442695, %v160_v19  ;;  %v2778_v54 = vmul.f32 -1.442695, %v163_v42  ;;  %v1306_v19 = vld [vmem:[%s5298_s1 + $0x268] sm:$0xff] }
 0x11e   :  { %v3348_v5 = vpop.eup %3347  ;;  %2513 = vst.msk [vmem:[%s5299_s2 + $0x208] sm:$0xff] %vm2447_vm0, %v2338_v61  ;;  %v2337_v6 = vmul.f32 %v1726_v1, %v1293_v57  ;;  %2045 = vperm.xlu0 %2801, %v4382_v22   ;;  %3367 = vrcp.f32 %v845_v62  ;;  %v847_v7 = vadd.f32 1.0, %v3346_v0  ;;  %v1298_v22 = vld [vmem:[%s5298_s1 + $0x228] sm:$0xff]  ;;  %v2781_v58 = vmul.f32 -1.442695, %v166_v46  ;;  %v1301_v0 = vld [vmem:[%s5298_s1 + $0x240] sm:$0xff] }
 0x11f   :  { %v3350_v10 = vpop.eup %3349  ;;  %v1741_v11 = vpop.permute.xlu1 %1740  ;;  %3369 = vrcp.f32 %v848_v3  ;;  %v850_v13 = vadd.f32 1.0, %v3348_v5  ;;  %v1302_v57 = vld [vmem:[%s5298_s1 + $0x248] sm:$0xff]  ;;  %v2780_v61 = vmul.f32 -1.442695, %v165_v51  ;;  %v1304_v5 = vld [vmem:[%s5298_s1 + $0x258] sm:$0xff]  ;;  %v1307_v42 = vld [vmem:[%s5298_s1 + $0x270] sm:$0xff] }
 0x120   :  { %v3352_v16 = vpop.eup %3351  ;;  %2512 = vst.msk [vmem:[%s5299_s2 + $0x200] sm:$0xff] %vm2447_vm0, %v2337_v6  ;;  %v2340_v17 = vmul.f32 %v1741_v11, %v1296_v2  ;;  %2060 = vperm.xlu1 %2802, %v3350_v10   ;;  %3371 = vrcp.f32 %v847_v7 }
 0x121   :  { %v3354_v20 = vpop.eup %3353  ;;  %v1736_v21 = vpop.permute.xlu0 %1735  ;;  %3373 = vrcp.f32 %v850_v13 }
 0x122   :  { %v3356_v25 = vpop.eup %3355  ;;  %2515 = vst.msk [vmem:[%s5299_s2 + $0x218] sm:$0xff] %vm2447_vm0, %v2340_v17  ;;  %v2339_v26 = vmul.f32 %v1736_v21, %v1295_v12  ;;  %2055 = vperm.xlu0 %2801, %v3352_v16   ;;  %3375 = vpow2.f32 %v2768_v8  ;;  %v1303_v12 = vld [vmem:[%s5298_s1 + $0x250] sm:$0xff] }
 0x123   :  { %v3358_v29 = vpop.eup %3357  ;;  %v1751_v30 = vpop.permute.xlu1 %1750  ;;  %3377 = vpow2.f32 %v2771_v14 }
 0x124   :  { %v3360_v34 = vpop.eup %3359  ;;  %2514 = vst.msk [vmem:[%s5299_s2 + $0x210] sm:$0xff] %vm2447_vm0, %v2339_v26  ;;  %v2342_v35 = vmul.f32 %v1751_v30, %v1298_v22  ;;  %2070 = vperm.xlu1 %2802, %v3354_v20   ;;  %3379 = vpow2.f32 %v2770_v18  ;;  %v1305_v26 = vld [vmem:[%s5298_s1 + $0x260] sm:$0xff] }
 0x125   :  { %v3362_v38 = vpop.eup %3361  ;;  %v1746_v39 = vpop.permute.xlu0 %1745  ;;  %3381 = vpow2.f32 %v2773_v23 }
 0x126   :  { %v3364_v43 = vpop.eup %3363  ;;  %2517 = vst.msk [vmem:[%s5299_s2 + $0x228] sm:$0xff] %vm2447_vm0, %v2342_v35  ;;  %v2341_v44 = vmul.f32 %v1746_v39, %v1297_v31  ;;  %2065 = vperm.xlu0 %2801, %v3356_v25   ;;  %3383 = vpow2.f32 %v2772_v27  ;;  %v168_v35 = vld [vmem:[%s5297_s0 + $0x4e8] sm:$0xff]  ;;  %v167_v39 = vld [vmem:[%s5297_s0 + $0x4e0] sm:$0xff] }
 0x127   :  { %v3366_v47 = vpop.eup %3365  ;;  %v1761_v48 = vpop.permute.xlu1 %1760  ;;  %3385 = vpow2.f32 %v2775_v32 }
 0x128   :  { %v3368_v52 = vpop.eup %3367  ;;  %2516 = vst.msk [vmem:[%s5299_s2 + $0x220] sm:$0xff] %vm2447_vm0, %v2341_v44  ;;  %v2344_v53 = vmul.f32 %v1761_v48, %v1300_v40  ;;  %2080 = vperm.xlu1 %2802, %v3358_v29   ;;  %3387 = vpow2.f32 %v2774_v36  ;;  %v170_v44 = vld [vmem:[%s5297_s0 + $0x4f8] sm:$0xff]  ;;  %v2783_v48 = vmul.f32 -1.442695, %v168_v35 }
 0x129   :  { %v3370_v55 = vpop.eup %3369  ;;  %v1756_v56 = vpop.permute.xlu0 %1755  ;;  %3389 = vpow2.f32 %v2777_v41 }
 0x12a   :  { %v4512_v59 = vpop.eup %3371  ;;  %2519 = vst.msk [vmem:[%s5299_s2 + $0x238] sm:$0xff] %vm2447_vm0, %v2344_v53  ;;  %v2343_v60 = vmul.f32 %v1756_v56, %v1299_v49  ;;  %2075 = vperm.xlu0 %2801, %v3360_v34   ;;  %3391 = vpow2.f32 %v2776_v45  ;;  %v169_v49 = vld [vmem:[%s5297_s0 + $0x4f0] sm:$0xff] }
 0x12b   :  { %v4518_v62 = vpop.eup %3373  ;;  %v1771_v63 = vpop.permute.xlu1 %1770  ;;  %3393 = vpow2.f32 %v2779_v50 }
 0x12c   :  { %v3376_v1 = vpop.eup %3375  ;;  %2518 = vst.msk [vmem:[%s5299_s2 + $0x230] sm:$0xff] %vm2447_vm0, %v2343_v60  ;;  %v2346_v2 = vmul.f32 %v1771_v63, %v1302_v57  ;;  %2090 = vperm.xlu1 %2802, %v3362_v38   ;;  %3395 = vpow2.f32 %v2778_v54  ;;  %v2782_v54 = vmul.f32 -1.442695, %v167_v39  ;;  %v2784_v63 = vmul.f32 -1.442695, %v169_v49 }
 0x12d   :  { %v3378_v3 = vpop.eup %3377  ;;  %v1766_v4 = vpop.permute.xlu0 %1765  ;;  %v849_v6 = vadd.f32 1.0, %v3376_v1  ;;  %3397 = vpow2.f32 %v2781_v58  ;;  %v2785_v58 = vmul.f32 -1.442695, %v170_v44  ;;  %v180_v44 = vld [vmem:[%s5297_s0 + $0x548] sm:$0xff] }
 0x12e   :  { %v3380_v7 = vpop.eup %3379  ;;  %2521 = vst.msk [vmem:[%s5299_s2 + $0x248] sm:$0xff] %vm2447_vm0, %v2346_v2  ;;  %v2345_v8 = vmul.f32 %v1766_v4, %v1301_v0  ;;  %2085 = vperm.xlu0 %2801, %v3364_v43   ;;  %v852_v9 = vadd.f32 1.0, %v3378_v3  ;;  %3399 = vpow2.f32 %v2780_v61  ;;  %v174_v0 = vld [vmem:[%s5297_s0 + $0x518] sm:$0xff]  ;;  %v173_v4 = vld [vmem:[%s5297_s0 + $0x510] sm:$0xff] }
 0x12f   :  { %v3382_v10 = vpop.eup %3381  ;;  %v1781_v11 = vpop.permute.xlu1 %1780  ;;  %3401 = vrcp.f32 %v849_v6  ;;  %v851_v13 = vadd.f32 1.0, %v3380_v7  ;;  %v1312_v7 = vld [vmem:[%s5298_s1 + $0x298] sm:$0xff] }
 0x130   :  { %v3384_v14 = vpop.eup %3383  ;;  %2520 = vst.msk [vmem:[%s5299_s2 + $0x240] sm:$0xff] %vm2447_vm0, %v2345_v8  ;;  %v2348_v15 = vmul.f32 %v1781_v11, %v1304_v5  ;;  %2100 = vperm.xlu1 %2802, %v3366_v47   ;;  %3403 = vrcp.f32 %v852_v9  ;;  %v854_v16 = vadd.f32 1.0, %v3382_v10  ;;  %v176_v9 = vld [vmem:[%s5297_s0 + $0x528] sm:$0xff] }
 0x131   :  { %v3386_v17 = vpop.eup %3385  ;;  %v1776_v18 = vpop.permute.xlu0 %1775  ;;  %3405 = vrcp.f32 %v851_v13  ;;  %v853_v20 = vadd.f32 1.0, %v3384_v14  ;;  %v175_v13 = vld [vmem:[%s5297_s0 + $0x520] sm:$0xff] }
 0x132   :  { %v3388_v21 = vpop.eup %3387  ;;  %2523 = vst.msk [vmem:[%s5299_s2 + $0x258] sm:$0xff] %vm2447_vm0, %v2348_v15  ;;  %v2347_v22 = vmul.f32 %v1776_v18, %v1303_v12  ;;  %2095 = vperm.xlu0 %2801, %v3368_v52   ;;  %3407 = vrcp.f32 %v854_v16  ;;  %v856_v23 = vadd.f32 1.0, %v3386_v17  ;;  %v1310_v52 = vld [vmem:[%s5298_s1 + $0x288] sm:$0xff]  ;;  %v2789_v12 = vmul.f32 -1.442695, %v174_v0  ;;  %v1311_v16 = vld [vmem:[%s5298_s1 + $0x290] sm:$0xff] }
 0x133   :  { %v3390_v24 = vpop.eup %3389  ;;  %v1791_v25 = vpop.permute.xlu1 %1790  ;;  %3409 = vrcp.f32 %v853_v20  ;;  %v855_v27 = vadd.f32 1.0, %v3388_v21  ;;  %v2788_v17 = vmul.f32 -1.442695, %v173_v4  ;;  %v2791_v20 = vmul.f32 -1.442695, %v176_v9 }
 0x134   :  { %v3392_v28 = vpop.eup %3391  ;;  %2522 = vst.msk [vmem:[%s5299_s2 + $0x250] sm:$0xff] %vm2447_vm0, %v2347_v22  ;;  %v2350_v29 = vmul.f32 %v1791_v25, %v1306_v19  ;;  %2110 = vperm.xlu1 %2802, %v3370_v55   ;;  %3411 = vrcp.f32 %v856_v23  ;;  %v858_v30 = vadd.f32 1.0, %v3390_v24  ;;  %v172_v55 = vld [vmem:[%s5297_s0 + $0x508] sm:$0xff]  ;;  %v2790_v24 = vmul.f32 -1.442695, %v175_v13  ;;  %v178_v25 = vld [vmem:[%s5297_s0 + $0x538] sm:$0xff] }
 0x135   :  { %v3394_v31 = vpop.eup %3393  ;;  %v1786_v32 = vpop.permute.xlu0 %1785  ;;  %3413 = vrcp.f32 %v855_v27  ;;  %v857_v34 = vadd.f32 1.0, %v3392_v28  ;;  %v2787_v3 = vmul.f32 -1.442695, %v172_v55  ;;  %v1314_v23 = vld [vmem:[%s5298_s1 + $0x2a8] sm:$0xff]  ;;  %v182_v13 = vld [vmem:[%s5297_s0 + $0x558] sm:$0xff] }
 0x136   :  { %v3396_v36 = vpop.eup %3395  ;;  %2525 = vst.msk [vmem:[%s5299_s2 + $0x268] sm:$0xff] %vm2447_vm0, %v2350_v29  ;;  %v2349_v37 = vmul.f32 %v1786_v32, %v1305_v26  ;;  %2105 = vperm.xlu0 %2801, %v4512_v59   ;;  %3415 = vrcp.f32 %v858_v30  ;;  %v860_v38 = vadd.f32 1.0, %v3394_v31  ;;  %v171_v59 = vld [vmem:[%s5297_s0 + $0x500] sm:$0xff] }
 0x137   :  { %v3398_v40 = vpop.eup %3397  ;;  %v1801_v41 = vpop.permute.xlu1 %1800  ;;  %3417 = vrcp.f32 %v857_v34  ;;  %v859_v43 = vadd.f32 1.0, %v3396_v36  ;;  %v2786_v8 = vmul.f32 -1.442695, %v171_v59  ;;  %v1313_v30 = vld [vmem:[%s5298_s1 + $0x2a0] sm:$0xff]  ;;  %v1316_v36 = vld [vmem:[%s5298_s1 + $0x2b8] sm:$0xff] }
 0x138   :  { %v3400_v45 = vpop.eup %3399  ;;  %2524 = vst.msk [vmem:[%s5299_s2 + $0x260] sm:$0xff] %vm2447_vm0, %v2349_v37  ;;  %v2352_v46 = vmul.f32 %v1801_v41, %v1308_v33  ;;  %2120 = vperm.xlu1 %2802, %v4518_v62   ;;  %3419 = vrcp.f32 %v860_v38  ;;  %v862_v47 = vadd.f32 1.0, %v3398_v40  ;;  %v1309_v62 = vld [vmem:[%s5298_s1 + $0x280] sm:$0xff]  ;;  %v2793_v33 = vmul.f32 -1.442695, %v178_v25  ;;  %v177_v37 = vld [vmem:[%s5297_s0 + $0x530] sm:$0xff] }
 0x139   :  { %v3402_v50 = vpop.eup %3401  ;;  %v1796_v51 = vpop.permute.xlu0 %1795  ;;  %3421 = vrcp.f32 %v859_v43  ;;  %v861_v53 = vadd.f32 1.0, %v3400_v45  ;;  %v1317_v59 = vld [vmem:[%s5298_s1 + $0x2c0] sm:$0xff]  ;;  %v2797_v25 = vmul.f32 -1.442695, %v182_v13 }
 0x13a   :  { %v3404_v56 = vpop.eup %3403  ;;  %2527 = vst.msk [vmem:[%s5299_s2 + $0x278] sm:$0xff] %vm2447_vm0, %v2352_v46  ;;  %v2351_v57 = vmul.f32 %v1796_v51, %v1307_v42  ;;  %2115 = vperm.xlu0 %2801, %v3402_v50   ;;  %3423 = vrcp.f32 %v862_v47  ;;  %v1315_v42 = vld [vmem:[%s5298_s1 + $0x2b0] sm:$0xff]  ;;  %v1318_v51 = vld [vmem:[%s5298_s1 + $0x2c8] sm:$0xff] }
 0x13b   :  { %v3406_v60 = vpop.eup %3405  ;;  %v1811_v61 = vpop.permute.xlu1 %1810  ;;  %3425 = vrcp.f32 %v861_v53 }
 0x13c   :  { %v3408_v1 = vpop.eup %3407  ;;  %2526 = vst.msk [vmem:[%s5299_s2 + $0x270] sm:$0xff] %vm2447_vm0, %v2351_v57  ;;  %v2354_v2 = vmul.f32 %v1811_v61, %v1310_v52  ;;  %2130 = vperm.xlu1 %2802, %v3404_v56   ;;  %3427 = vpow2.f32 %v2783_v48  ;;  %v2792_v48 = vmul.f32 -1.442695, %v177_v37  ;;  %v2795_v56 = vmul.f32 -1.442695, %v180_v44 }
 0x13d   :  { %v3410_v5 = vpop.eup %3409  ;;  %v1806_v6 = vpop.permute.xlu0 %1805  ;;  %3429 = vpow2.f32 %v2782_v54 }
 0x13e   :  { %v3412_v10 = vpop.eup %3411  ;;  %2529 = vst.msk [vmem:[%s5299_s2 + $0x288] sm:$0xff] %vm2447_vm0, %v2354_v2  ;;  %v2353_v11 = vmul.f32 %v1806_v6, %v1309_v62  ;;  %2125 = vperm.xlu0 %2801, %v3406_v60   ;;  %3431 = vpow2.f32 %v2785_v58 }
 0x13f   :  { %v3414_v14 = vpop.eup %3413  ;;  %v1821_v15 = vpop.permute.xlu1 %1820  ;;  %3433 = vpow2.f32 %v2784_v63 }
 0x140   :  { %v3416_v18 = vpop.eup %3415  ;;  %2528 = vst.msk [vmem:[%s5299_s2 + $0x280] sm:$0xff] %vm2447_vm0, %v2353_v11  ;;  %v2356_v19 = vmul.f32 %v1821_v15, %v1312_v7  ;;  %2140 = vperm.xlu1 %2802, %v3408_v1   ;;  %3435 = vpow2.f32 %v2787_v3  ;;  %v1320_v1 = vld [vmem:[%s5298_s1 + $0x2d8] sm:$0xff]  ;;  %v1322_v15 = vld [vmem:[%s5298_s1 + $0x2e8] sm:$0xff] }
 0x141   :  { %v3418_v21 = vpop.eup %3417  ;;  %v1816_v22 = vpop.permute.xlu0 %1815  ;;  %3437 = vpow2.f32 %v2786_v8  ;;  %v1319_v8 = vld [vmem:[%s5298_s1 + $0x2d0] sm:$0xff] }
 0x142   :  { %v3420_v26 = vpop.eup %3419  ;;  %2531 = vst.msk [vmem:[%s5299_s2 + $0x298] sm:$0xff] %vm2447_vm0, %v2356_v19  ;;  %v2355_v27 = vmul.f32 %v1816_v22, %v1311_v16  ;;  %2135 = vperm.xlu0 %2801, %v3410_v5   ;;  %3439 = vpow2.f32 %v2789_v12 }
 0x143   :  { %v3422_v28 = vpop.eup %3421  ;;  %v1831_v29 = vpop.permute.xlu1 %1830  ;;  %3441 = vpow2.f32 %v2788_v17  ;;  %v181_v17 = vld [vmem:[%s5297_s0 + $0x550] sm:$0xff] }
 0x144   :  { %v4642_v31 = vpop.eup %3423  ;;  %2530 = vst.msk [vmem:[%s5299_s2 + $0x290] sm:$0xff] %vm2447_vm0, %v2355_v27  ;;  %v2358_v32 = vmul.f32 %v1831_v29, %v1314_v23  ;;  %2150 = vperm.xlu1 %2802, %v3412_v10   ;;  %3443 = vpow2.f32 %v2791_v20  ;;  %v179_v10 = vld [vmem:[%s5297_s0 + $0x540] sm:$0xff]  ;;  %v2796_v29 = vmul.f32 -1.442695, %v181_v17 }
 0x145   :  { %v4648_v34 = vpop.eup %3425  ;;  %v1826_v35 = vpop.permute.xlu0 %1825  ;;  %3445 = vpow2.f32 %v2790_v24  ;;  %v2794_v20 = vmul.f32 -1.442695, %v179_v10  ;;  %v1321_v24 = vld [vmem:[%s5298_s1 + $0x2e0] sm:$0xff] }
 0x146   :  { %v3428_v38 = vpop.eup %3427  ;;  %2533 = vst.msk [vmem:[%s5299_s2 + $0x2a8] sm:$0xff] %vm2447_vm0, %v2358_v32  ;;  %v2357_v39 = vmul.f32 %v1826_v35, %v1313_v30  ;;  %2145 = vperm.xlu0 %2801, %v3414_v14   ;;  %3447 = vpow2.f32 %v2793_v33  ;;  %v1324_v32 = vld [vmem:[%s5298_s1 + $0x2f8] sm:$0xff] }
 0x147   :  { %v3430_v40 = vpop.eup %3429  ;;  %v1841_v41 = vpop.permute.xlu1 %1840  ;;  %v864_v43 = vadd.f32 1.0, %v3428_v38 }
 0x148   :  { %v3432_v45 = vpop.eup %3431  ;;  %2532 = vst.msk [vmem:[%s5299_s2 + $0x2a0] sm:$0xff] %vm2447_vm0, %v2357_v39  ;;  %v2360_v46 = vmul.f32 %v1841_v41, %v1316_v36  ;;  %2160 = vperm.xlu1 %2802, %v3416_v18   ;;  %v863_v47 = vadd.f32 1.0, %v3430_v40  ;;  %v1323_v39 = vld [vmem:[%s5298_s1 + $0x2f0] sm:$0xff] }
 0x149   :  { %v3434_v49 = vpop.eup %3433  ;;  %v1836_v50 = vpop.permute.xlu0 %1835  ;;  %3449 = vrcp.f32 %v864_v43  ;;  %v866_v52 = vadd.f32 1.0, %v3432_v45  ;;  %v1326_v45 = vld [vmem:[%s5298_s1 + $0x308] sm:$0xff] }
 0x14a   :  { %v3436_v53 = vpop.eup %3435  ;;  %2535 = vst.msk [vmem:[%s5299_s2 + $0x2b8] sm:$0xff] %vm2447_vm0, %v2360_v46  ;;  %v2359_v54 = vmul.f32 %v1836_v50, %v1315_v42  ;;  %2155 = vperm.xlu0 %2801, %v3418_v21   ;;  %3451 = vrcp.f32 %v863_v47  ;;  %v865_v55 = vadd.f32 1.0, %v3434_v49  ;;  %v184_v21 = vld [vmem:[%s5297_s0 + $0x568] sm:$0xff]  ;;  %v1325_v50 = vld [vmem:[%s5298_s1 + $0x300] sm:$0xff] }
 0x14b   :  { %v3438_v57 = vpop.eup %3437  ;;  %v1851_v58 = vpop.permute.xlu1 %1850  ;;  %3453 = vrcp.f32 %v866_v52  ;;  %v868_v60 = vadd.f32 1.0, %v3436_v53  ;;  %v2799_v33 = vmul.f32 -1.442695, %v184_v21  ;;  %v1331_v21 = vld [vmem:[%s5298_s1 + $0x330] sm:$0xff] }
 0x14c   :  { %v3440_v61 = vpop.eup %3439  ;;  %2534 = vst.msk [vmem:[%s5299_s2 + $0x2b0] sm:$0xff] %vm2447_vm0, %v2359_v54  ;;  %v2362_v62 = vmul.f32 %v1851_v58, %v1318_v51  ;;  %2170 = vperm.xlu1 %2802, %v3420_v26   ;;  %3455 = vpow2.f32 %v2792_v48  ;;  %v867_v2 = vadd.f32 1.0, %v3438_v57  ;;  %v183_v26 = vld [vmem:[%s5297_s0 + $0x560] sm:$0xff] }
 0x14d   :  { %v3442_v63 = vpop.eup %3441  ;;  %v1846_v0 = vpop.permute.xlu0 %1845  ;;  %3457 = vrcp.f32 %v865_v55  ;;  %v870_v5 = vadd.f32 1.0, %v3440_v61  ;;  %v2798_v36 = vmul.f32 -1.442695, %v183_v26  ;;  %v1327_v61 = vld [vmem:[%s5298_s1 + $0x310] sm:$0xff] }
 0x14e   :  { %v3444_v3 = vpop.eup %3443  ;;  %2537 = vst.msk [vmem:[%s5299_s2 + $0x2c8] sm:$0xff] %vm2447_vm0, %v2362_v62  ;;  %v2361_v4 = vmul.f32 %v1846_v0, %v1317_v59  ;;  %2165 = vperm.xlu0 %2801, %v3422_v28   ;;  %3459 = vpow2.f32 %v2795_v56  ;;  %v869_v9 = vadd.f32 1.0, %v3442_v63  ;;  %v1328_v56 = vld [vmem:[%s5298_s1 + $0x318] sm:$0xff] }
 0x14f   :  { %v3446_v6 = vpop.eup %3445  ;;  %v1861_v7 = vpop.permute.xlu1 %1860  ;;  %3461 = vrcp.f32 %v868_v60  ;;  %v872_v12 = vadd.f32 1.0, %v3444_v3 }
 0x150   :  { %2536 = vst.msk [vmem:[%s5299_s2 + $0x2c0] sm:$0xff] %vm2447_vm0, %v2361_v4  ;;  %v2364_v11 = vmul.f32 %v1861_v7, %v1320_v1  ;;  %2180 = vperm.xlu1 %2802, %v4642_v31   ;;  %3463 = vrcp.f32 %v867_v2  ;;  %v871_v16 = vadd.f32 1.0, %v3446_v6  ;;  %v3448_v18 = vpop.eup %3447  ;;  %v1330_v2 = vld [vmem:[%s5298_s1 + $0x328] sm:$0xff] }
 0x151   :  { %v1856_v14 = vpop.permute.xlu0 %1855  ;;  %3465 = vrcp.f32 %v870_v5  ;;  %v874_v40 = vadd.f32 1.0, %v3448_v18 }
 0x152   :  { %2539 = vst.msk [vmem:[%s5299_s2 + $0x2d8] sm:$0xff] %vm2447_vm0, %v2364_v11  ;;  %v2363_v19 = vmul.f32 %v1856_v14, %v1319_v8  ;;  %2175 = vperm.xlu0 %2801, %v4648_v34   ;;  %3467 = vrcp.f32 %v869_v9  ;;  %v1329_v9 = vld [vmem:[%s5298_s1 + $0x320] sm:$0xff] }
 0x153   :  { %v3450_v22 = vpop.eup %3449  ;;  %v1871_v23 = vpop.permute.xlu1 %1870  ;;  %3469 = vrcp.f32 %v872_v12 }
 0x154   :  { %v3452_v27 = vpop.eup %3451  ;;  %2538 = vst.msk [vmem:[%s5299_s2 + $0x2d0] sm:$0xff] %vm2447_vm0, %v2363_v19  ;;  %v2366_v28 = vmul.f32 %v1871_v23, %v1322_v15  ;;  %2190 = vperm.xlu1 %2802, %v3450_v22   ;;  %3471 = vrcp.f32 %v871_v16  ;;  %v1332_v16 = vld [vmem:[%s5298_s1 + $0x338] sm:$0xff] }
 0x155   :  { %v3454_v30 = vpop.eup %3453  ;;  %v1866_v31 = vpop.permute.xlu0 %1865  ;;  %3473 = vpow2.f32 %v2794_v20 }
 0x156   :  { %v3456_v34 = vpop.eup %3455  ;;  %2541 = vst.msk [vmem:[%s5299_s2 + $0x2e8] sm:$0xff] %vm2447_vm0, %v2366_v28  ;;  %v2365_v35 = vmul.f32 %v1866_v31, %v1321_v24  ;;  %2185 = vperm.xlu0 %2801, %v3452_v27   ;;  %3475 = vpow2.f32 %v2797_v25  ;;  %v1334_v25 = vld [vmem:[%s5298_s1 + $0x348] sm:$0xff]  ;;  %v1333_v28 = vld [vmem:[%s5298_s1 + $0x340] sm:$0xff] }
 0x157   :  { %v3458_v37 = vpop.eup %3457  ;;  %v1881_v38 = vpop.permute.xlu1 %1880  ;;  %3477 = vpow2.f32 %v2796_v29  ;;  %v873_v46 = vadd.f32 1.0, %v3456_v34 }
 0x158   :  { %v3460_v41 = vpop.eup %3459  ;;  %2540 = vst.msk [vmem:[%s5299_s2 + $0x2e0] sm:$0xff] %vm2447_vm0, %v2365_v35  ;;  %v2368_v42 = vmul.f32 %v1881_v38, %v1324_v32  ;;  %2200 = vperm.xlu1 %2802, %v3454_v30   ;;  %3479 = vpow2.f32 %v2799_v33  ;;  %v1336_v32 = vld [vmem:[%s5298_s1 + $0x358] sm:$0xff] }
 0x159   :  { %v3462_v43 = vpop.eup %3461  ;;  %v1876_v44 = vpop.permute.xlu0 %1875  ;;  %3481 = vpow2.f32 %v2798_v36  ;;  %v876_v51 = vadd.f32 1.0, %v3460_v41  ;;  %v1338_v41 = vld [vmem:[%s5298_s1 + $0x368] sm:$0xff] }
 0x15a   :  { %2543 = vst.msk [vmem:[%s5299_s2 + $0x2f8] sm:$0xff] %vm2447_vm0, %v2368_v42  ;;  %v2367_v47 = vmul.f32 %v1876_v44, %v1323_v39  ;;  %2195 = vperm.xlu0 %2801, %v3458_v37   ;;  %v3464_v48 = vpop.eup %3463  ;;  %3483 = vrcp.f32 %v874_v40  ;;  %v1335_v37 = vld [vmem:[%s5298_s1 + $0x350] sm:$0xff] }
 0x15b   :  { %v1891_v49 = vpop.permute.xlu1 %1890  ;;  %v3466_v52 = vpop.eup %3465  ;;  %3485 = vrcp.f32 %v873_v46 }
 0x15c   :  { %2542 = vst.msk [vmem:[%s5299_s2 + $0x2f0] sm:$0xff] %vm2447_vm0, %v2367_v47  ;;  %v2370_v53 = vmul.f32 %v1891_v49, %v1326_v45  ;;  %2210 = vperm.xlu1 %2802, %v3462_v43   ;;  %v3468_v54 = vpop.eup %3467  ;;  %3487 = vrcp.f32 %v876_v51  ;;  %v1337_v45 = vld [vmem:[%s5298_s1 + $0x360] sm:$0xff]  ;;  %v1339_v51 = vld [vmem:[%s5298_s1 + $0x370] sm:$0xff] }
 0x15d   :  { %v1886_v55 = vpop.permute.xlu0 %1885  ;;  %v3470_v57 = vpop.eup %3469 }
 0x15e   :  { %2545 = vst.msk [vmem:[%s5299_s2 + $0x308] sm:$0xff] %vm2447_vm0, %v2370_v53  ;;  %v2369_v58 = vmul.f32 %v1886_v55, %v1325_v50  ;;  %2205 = vperm.xlu0 %2801, %v3464_v48   ;;  %v3472_v59 = vpop.eup %3471  ;;  %v1340_v48 = vld [vmem:[%s5298_s1 + $0x378] sm:$0xff] }
 0x15f   :  { %v1901_v60 = vpop.permute.xlu1 %1900  ;;  %v3474_v62 = vpop.eup %3473 }
 0x160   :  { %2544 = vst.msk [vmem:[%s5299_s2 + $0x300] sm:$0xff] %vm2447_vm0, %v2369_v58  ;;  %v2372_v63 = vmul.f32 %v1901_v60, %v1328_v56  ;;  %2220 = vperm.xlu1 %2802, %v3466_v52   ;;  %v3476_v0 = vpop.eup %3475  ;;  %v875_v3 = vadd.f32 1.0, %v3474_v62  ;;  %v1344_v60 = vld [vmem:[%s5298_s1 + $0x398] sm:$0xff] }
 0x161   :  { %v1896_v1 = vpop.permute.xlu0 %1895  ;;  %v3478_v4 = vpop.eup %3477  ;;  %v878_v6 = vadd.f32 1.0, %v3476_v0 }
 0x162   :  { %2547 = vst.msk [vmem:[%s5299_s2 + $0x318] sm:$0xff] %vm2447_vm0, %v2372_v63  ;;  %v2371_v5 = vmul.f32 %v1896_v1, %v1327_v61  ;;  %2215 = vperm.xlu0 %2801, %v3468_v54   ;;  %v3480_v7 = vpop.eup %3479  ;;  %3489 = vrcp.f32 %v875_v3  ;;  %v877_v10 = vadd.f32 1.0, %v3478_v4  ;;  %v1342_v54 = vld [vmem:[%s5298_s1 + $0x388] sm:$0xff]  ;;  %v1343_v63 = vld [vmem:[%s5298_s1 + $0x390] sm:$0xff] }
 0x163   :  { %v1911_v8 = vpop.permute.xlu1 %1910  ;;  %v3482_v11 = vpop.eup %3481  ;;  %3491 = vrcp.f32 %v878_v6  ;;  %v880_v13 = vadd.f32 1.0, %v3480_v7 }
 0x164   :  { %2546 = vst.msk [vmem:[%s5299_s2 + $0x310] sm:$0xff] %vm2447_vm0, %v2371_v5  ;;  %v2374_v12 = vmul.f32 %v1911_v8, %v1330_v2  ;;  %2230 = vperm.xlu1 %2802, %v3470_v57   ;;  %v3484_v14 = vpop.eup %3483  ;;  %3493 = vrcp.f32 %v877_v10  ;;  %v879_v17 = vadd.f32 1.0, %v3482_v11  ;;  %v1341_v57 = vld [vmem:[%s5298_s1 + $0x380] sm:$0xff]  ;;  %v1346_v2 = vld [vmem:[%s5298_s1 + $0x3a8] sm:$0xff]  ;;  %v1348_v8 = vld [vmem:[%s5298_s1 + $0x3b8] sm:$0xff] }
 0x165   :  { %v1906_v15 = vpop.permute.xlu0 %1905  ;;  %v3486_v19 = vpop.eup %3485  ;;  %3495 = vrcp.f32 %v880_v13  ;;  %v1345_v5 = vld [vmem:[%s5298_s1 + $0x3a0] sm:$0xff]  ;;  %v1347_v11 = vld [vmem:[%s5298_s1 + $0x3b0] sm:$0xff] }
 0x166   :  { %2549 = vst.msk [vmem:[%s5299_s2 + $0x328] sm:$0xff] %vm2447_vm0, %v2374_v12  ;;  %v2373_v18 = vmul.f32 %v1906_v15, %v1329_v9  ;;  %2225 = vperm.xlu0 %2801, %v3472_v59   ;;  %v3488_v23 = vpop.eup %3487  ;;  %3497 = vrcp.f32 %v879_v17  ;;  %v1349_v17 = vld [vmem:[%s5298_s1 + $0x3c0] sm:$0xff] }
 0x167   :  { %v1921_v20 = vpop.permute.xlu1 %1920 }
 0x168   :  { %2548 = vst.msk [vmem:[%s5299_s2 + $0x320] sm:$0xff] %vm2447_vm0, %v2373_v18  ;;  %v2376_v22 = vmul.f32 %v1921_v20, %v1332_v16  ;;  %2240 = vperm.xlu1 %2802, %v3484_v14   ;;  %v1350_v14 = vld [vmem:[%s5298_s1 + $0x3c8] sm:$0xff]  ;;  %v1352_v20 = vld [vmem:[%s5298_s1 + $0x3d8] sm:$0xff] }
 0x169   :  { %v1916_v24 = vpop.permute.xlu0 %1915 }
 0x16a   :  { %2551 = vst.msk [vmem:[%s5299_s2 + $0x338] sm:$0xff] %vm2447_vm0, %v2376_v22  ;;  %v2375_v26 = vmul.f32 %v1916_v24, %v1331_v21  ;;  %2235 = vperm.xlu0 %2801, %v3486_v19  }
 0x16b   :  { %v1931_v27 = vpop.permute.xlu1 %1930 }
 0x16c   :  { %2550 = vst.msk [vmem:[%s5299_s2 + $0x330] sm:$0xff] %vm2447_vm0, %v2375_v26  ;;  %v2378_v29 = vmul.f32 %v1931_v27, %v1334_v25  ;;  %2250 = vperm.xlu1 %2802, %v3488_v23   ;;  %v3490_v30 = vpop.eup %3489  ;;  %v1351_v23 = vld [vmem:[%s5298_s1 + $0x3d0] sm:$0xff]  ;;  %v1354_v26 = vld [vmem:[%s5298_s1 + $0x3e8] sm:$0xff] }
 0x16d   :  { %v1926_v31 = vpop.permute.xlu0 %1925  ;;  %v3492_v33 = vpop.eup %3491 }
 0x16e   :  { %2553 = vst.msk [vmem:[%s5299_s2 + $0x348] sm:$0xff] %vm2447_vm0, %v2378_v29  ;;  %v2377_v34 = vmul.f32 %v1926_v31, %v1333_v28  ;;  %2245 = vperm.xlu0 %2801, %v3490_v30   ;;  %v3494_v35 = vpop.eup %3493  ;;  %v1353_v29 = vld [vmem:[%s5298_s1 + $0x3e0] sm:$0xff] }
 0x16f   :  { %v1941_v36 = vpop.permute.xlu1 %1940  ;;  %v3496_v39 = vpop.eup %3495 }
 0x170   :  { %2552 = vst.msk [vmem:[%s5299_s2 + $0x340] sm:$0xff] %vm2447_vm0, %v2377_v34  ;;  %v2380_v38 = vmul.f32 %v1941_v36, %v1336_v32  ;;  %2260 = vperm.xlu1 %2802, %v3492_v33   ;;  %v3498_v43 = vpop.eup %3497  ;;  %v1356_v32 = vld [vmem:[%s5298_s1 + $0x3f8] sm:$0xff] }
 0x171   :  { %v1936_v40 = vpop.permute.xlu0 %1935 }
 0x172   :  { %2555 = vst.msk [vmem:[%s5299_s2 + $0x358] sm:$0xff] %vm2447_vm0, %v2380_v38  ;;  %v2379_v42 = vmul.f32 %v1936_v40, %v1335_v37  ;;  %2255 = vperm.xlu0 %2801, %v3494_v35   ;;  %v1355_v35 = vld [vmem:[%s5298_s1 + $0x3f0] sm:$0xff]  ;;  %v1358_v38 = vld [vmem:[%s5298_s1 + $0x408] sm:$0xff] }
 0x173   :  { %v1951_v44 = vpop.permute.xlu1 %1950 }
 0x174   :  { %2554 = vst.msk [vmem:[%s5299_s2 + $0x350] sm:$0xff] %vm2447_vm0, %v2379_v42  ;;  %v2382_v46 = vmul.f32 %v1951_v44, %v1338_v41  ;;  %2270 = vperm.xlu1 %2802, %v3496_v39   ;;  %v1357_v41 = vld [vmem:[%s5298_s1 + $0x400] sm:$0xff]  ;;  %v1360_v44 = vld [vmem:[%s5298_s1 + $0x418] sm:$0xff] }
 0x175   :  { %v1946_v47 = vpop.permute.xlu0 %1945 }
 0x176   :  { %2557 = vst.msk [vmem:[%s5299_s2 + $0x368] sm:$0xff] %vm2447_vm0, %v2382_v46  ;;  %v2381_v49 = vmul.f32 %v1946_v47, %v1337_v45  ;;  %2265 = vperm.xlu0 %2801, %v3498_v43   ;;  %v1359_v47 = vld [vmem:[%s5298_s1 + $0x410] sm:$0xff] }
 0x177   :  { %v1961_v50 = vpop.permute.xlu1 %1960 }
 0x178   :  { %2556 = vst.msk [vmem:[%s5299_s2 + $0x360] sm:$0xff] %vm2447_vm0, %v2381_v49  ;;  %v2384_v52 = vmul.f32 %v1961_v50, %v1340_v48  ;;  %v1362_v50 = vld [vmem:[%s5298_s1 + $0x428] sm:$0xff] }
 0x179   :  { %v1956_v53 = vpop.permute.xlu0 %1955 }
 0x17a   :  { %2559 = vst.msk [vmem:[%s5299_s2 + $0x378] sm:$0xff] %vm2447_vm0, %v2384_v52  ;;  %v2383_v55 = vmul.f32 %v1956_v53, %v1339_v51  ;;  %v1361_v53 = vld [vmem:[%s5298_s1 + $0x420] sm:$0xff] }
 0x17b   :  { %v1971_v56 = vpop.permute.xlu1 %1970 }
 0x17c   :  { %2558 = vst.msk [vmem:[%s5299_s2 + $0x370] sm:$0xff] %vm2447_vm0, %v2383_v55  ;;  %v2386_v58 = vmul.f32 %v1971_v56, %v1342_v54  ;;  %v1364_v56 = vld [vmem:[%s5298_s1 + $0x438] sm:$0xff] }
 0x17d   :  { %v1966_v59 = vpop.permute.xlu0 %1965 }
 0x17e   :  { %2561 = vst.msk [vmem:[%s5299_s2 + $0x388] sm:$0xff] %vm2447_vm0, %v2386_v58  ;;  %v2385_v61 = vmul.f32 %v1966_v59, %v1341_v57  ;;  %v1363_v59 = vld [vmem:[%s5298_s1 + $0x430] sm:$0xff] }
 0x17f   :  { %v1981_v62 = vpop.permute.xlu1 %1980 }
 0x180   :  { %2560 = vst.msk [vmem:[%s5299_s2 + $0x380] sm:$0xff] %vm2447_vm0, %v2385_v61  ;;  %v2388_v0 = vmul.f32 %v1981_v62, %v1344_v60  ;;  %v1366_v62 = vld [vmem:[%s5298_s1 + $0x448] sm:$0xff] }
 0x181   :  { %v1976_v1 = vpop.permute.xlu0 %1975 }
 0x182   :  { %2563 = vst.msk [vmem:[%s5299_s2 + $0x398] sm:$0xff] %vm2447_vm0, %v2388_v0  ;;  %v2387_v3 = vmul.f32 %v1976_v1, %v1343_v63  ;;  %v1365_v1 = vld [vmem:[%s5298_s1 + $0x440] sm:$0xff] }
 0x183   :  { %v1991_v4 = vpop.permute.xlu1 %1990 }
 0x184   :  { %2562 = vst.msk [vmem:[%s5299_s2 + $0x390] sm:$0xff] %vm2447_vm0, %v2387_v3  ;;  %v2390_v6 = vmul.f32 %v1991_v4, %v1346_v2  ;;  %v1368_v4 = vld [vmem:[%s5298_s1 + $0x458] sm:$0xff] }
 0x185   :  { %v1986_v7 = vpop.permute.xlu0 %1985 }
 0x186   :  { %2565 = vst.msk [vmem:[%s5299_s2 + $0x3a8] sm:$0xff] %vm2447_vm0, %v2390_v6  ;;  %v2389_v9 = vmul.f32 %v1986_v7, %v1345_v5  ;;  %v1367_v7 = vld [vmem:[%s5298_s1 + $0x450] sm:$0xff] }
 0x187   :  { %v2001_v10 = vpop.permute.xlu1 %2000 }
 0x188   :  { %2564 = vst.msk [vmem:[%s5299_s2 + $0x3a0] sm:$0xff] %vm2447_vm0, %v2389_v9  ;;  %v2392_v12 = vmul.f32 %v2001_v10, %v1348_v8  ;;  %v1370_v10 = vld [vmem:[%s5298_s1 + $0x468] sm:$0xff] }
 0x189   :  { %v1996_v13 = vpop.permute.xlu0 %1995 }
 0x18a   :  { %2567 = vst.msk [vmem:[%s5299_s2 + $0x3b8] sm:$0xff] %vm2447_vm0, %v2392_v12  ;;  %v2391_v15 = vmul.f32 %v1996_v13, %v1347_v11  ;;  %v1369_v13 = vld [vmem:[%s5298_s1 + $0x460] sm:$0xff] }
 0x18b   :  { %v2011_v16 = vpop.permute.xlu1 %2010 }
 0x18c   :  { %2566 = vst.msk [vmem:[%s5299_s2 + $0x3b0] sm:$0xff] %vm2447_vm0, %v2391_v15  ;;  %v2394_v18 = vmul.f32 %v2011_v16, %v1350_v14  ;;  %v1372_v16 = vld [vmem:[%s5298_s1 + $0x478] sm:$0xff] }
 0x18d   :  { %v2006_v19 = vpop.permute.xlu0 %2005 }
 0x18e   :  { %2569 = vst.msk [vmem:[%s5299_s2 + $0x3c8] sm:$0xff] %vm2447_vm0, %v2394_v18  ;;  %v2393_v21 = vmul.f32 %v2006_v19, %v1349_v17  ;;  %v1371_v19 = vld [vmem:[%s5298_s1 + $0x470] sm:$0xff] }
 0x18f   :  { %v2021_v22 = vpop.permute.xlu1 %2020 }
 0x190   :  { %2568 = vst.msk [vmem:[%s5299_s2 + $0x3c0] sm:$0xff] %vm2447_vm0, %v2393_v21  ;;  %v2396_v24 = vmul.f32 %v2021_v22, %v1352_v20  ;;  %v1374_v22 = vld [vmem:[%s5298_s1 + $0x488] sm:$0xff] }
 0x191   :  { %v2016_v25 = vpop.permute.xlu0 %2015 }
 0x192   :  { %2571 = vst.msk [vmem:[%s5299_s2 + $0x3d8] sm:$0xff] %vm2447_vm0, %v2396_v24  ;;  %v2395_v27 = vmul.f32 %v2016_v25, %v1351_v23  ;;  %v1373_v25 = vld [vmem:[%s5298_s1 + $0x480] sm:$0xff] }
 0x193   :  { %v2031_v28 = vpop.permute.xlu1 %2030 }
 0x194   :  { %2570 = vst.msk [vmem:[%s5299_s2 + $0x3d0] sm:$0xff] %vm2447_vm0, %v2395_v27  ;;  %v2398_v30 = vmul.f32 %v2031_v28, %v1354_v26  ;;  %v1376_v28 = vld [vmem:[%s5298_s1 + $0x498] sm:$0xff] }
 0x195   :  { %v2026_v31 = vpop.permute.xlu0 %2025 }
 0x196   :  { %2573 = vst.msk [vmem:[%s5299_s2 + $0x3e8] sm:$0xff] %vm2447_vm0, %v2398_v30  ;;  %v2397_v33 = vmul.f32 %v2026_v31, %v1353_v29  ;;  %v1375_v31 = vld [vmem:[%s5298_s1 + $0x490] sm:$0xff] }
 0x197   :  { %v2041_v34 = vpop.permute.xlu1 %2040 }
 0x198   :  { %2572 = vst.msk [vmem:[%s5299_s2 + $0x3e0] sm:$0xff] %vm2447_vm0, %v2397_v33  ;;  %v2400_v36 = vmul.f32 %v2041_v34, %v1356_v32  ;;  %v1378_v34 = vld [vmem:[%s5298_s1 + $0x4a8] sm:$0xff] }
 0x199   :  { %v2036_v37 = vpop.permute.xlu0 %2035 }
 0x19a   :  { %2575 = vst.msk [vmem:[%s5299_s2 + $0x3f8] sm:$0xff] %vm2447_vm0, %v2400_v36  ;;  %v2399_v39 = vmul.f32 %v2036_v37, %v1355_v35  ;;  %v1377_v37 = vld [vmem:[%s5298_s1 + $0x4a0] sm:$0xff] }
 0x19b   :  { %v2051_v40 = vpop.permute.xlu1 %2050 }
 0x19c   :  { %2574 = vst.msk [vmem:[%s5299_s2 + $0x3f0] sm:$0xff] %vm2447_vm0, %v2399_v39  ;;  %v2402_v42 = vmul.f32 %v2051_v40, %v1358_v38  ;;  %v1380_v40 = vld [vmem:[%s5298_s1 + $0x4b8] sm:$0xff] }
 0x19d   :  { %v2046_v43 = vpop.permute.xlu0 %2045 }
 0x19e   :  { %2577 = vst.msk [vmem:[%s5299_s2 + $0x408] sm:$0xff] %vm2447_vm0, %v2402_v42  ;;  %v2401_v45 = vmul.f32 %v2046_v43, %v1357_v41  ;;  %v1379_v43 = vld [vmem:[%s5298_s1 + $0x4b0] sm:$0xff] }
 0x19f   :  { %v2061_v46 = vpop.permute.xlu1 %2060 }
 0x1a0   :  { %2576 = vst.msk [vmem:[%s5299_s2 + $0x400] sm:$0xff] %vm2447_vm0, %v2401_v45  ;;  %v2404_v48 = vmul.f32 %v2061_v46, %v1360_v44  ;;  %v1382_v46 = vld [vmem:[%s5298_s1 + $0x4c8] sm:$0xff] }
 0x1a1   :  { %v2056_v49 = vpop.permute.xlu0 %2055 }
 0x1a2   :  { %2579 = vst.msk [vmem:[%s5299_s2 + $0x418] sm:$0xff] %vm2447_vm0, %v2404_v48  ;;  %v2403_v51 = vmul.f32 %v2056_v49, %v1359_v47  ;;  %v1381_v49 = vld [vmem:[%s5298_s1 + $0x4c0] sm:$0xff] }
 0x1a3   :  { %v2071_v52 = vpop.permute.xlu1 %2070 }
 0x1a4   :  { %2578 = vst.msk [vmem:[%s5299_s2 + $0x410] sm:$0xff] %vm2447_vm0, %v2403_v51  ;;  %v2406_v54 = vmul.f32 %v2071_v52, %v1362_v50  ;;  %v1384_v52 = vld [vmem:[%s5298_s1 + $0x4d8] sm:$0xff] }
 0x1a5   :  { %v2066_v55 = vpop.permute.xlu0 %2065 }
 0x1a6   :  { %2581 = vst.msk [vmem:[%s5299_s2 + $0x428] sm:$0xff] %vm2447_vm0, %v2406_v54  ;;  %v2405_v57 = vmul.f32 %v2066_v55, %v1361_v53  ;;  %v1383_v55 = vld [vmem:[%s5298_s1 + $0x4d0] sm:$0xff] }
 0x1a7   :  { %v2081_v58 = vpop.permute.xlu1 %2080 }
 0x1a8   :  { %2580 = vst.msk [vmem:[%s5299_s2 + $0x420] sm:$0xff] %vm2447_vm0, %v2405_v57  ;;  %v2408_v60 = vmul.f32 %v2081_v58, %v1364_v56  ;;  %v1386_v58 = vld [vmem:[%s5298_s1 + $0x4e8] sm:$0xff] }
 0x1a9   :  { %v2076_v61 = vpop.permute.xlu0 %2075 }
 0x1aa   :  { %2583 = vst.msk [vmem:[%s5299_s2 + $0x438] sm:$0xff] %vm2447_vm0, %v2408_v60  ;;  %v2407_v63 = vmul.f32 %v2076_v61, %v1363_v59  ;;  %v1385_v61 = vld [vmem:[%s5298_s1 + $0x4e0] sm:$0xff] }
 0x1ab   :  { %v2091_v0 = vpop.permute.xlu1 %2090 }
 0x1ac   :  { %2582 = vst.msk [vmem:[%s5299_s2 + $0x430] sm:$0xff] %vm2447_vm0, %v2407_v63  ;;  %v2410_v2 = vmul.f32 %v2091_v0, %v1366_v62  ;;  %v1388_v0 = vld [vmem:[%s5298_s1 + $0x4f8] sm:$0xff] }
 0x1ad   :  { %v2086_v3 = vpop.permute.xlu0 %2085 }
 0x1ae   :  { %2585 = vst.msk [vmem:[%s5299_s2 + $0x448] sm:$0xff] %vm2447_vm0, %v2410_v2  ;;  %v2409_v5 = vmul.f32 %v2086_v3, %v1365_v1  ;;  %v1387_v3 = vld [vmem:[%s5298_s1 + $0x4f0] sm:$0xff] }
 0x1af   :  { %v2101_v6 = vpop.permute.xlu1 %2100 }
 0x1b0   :  { %2584 = vst.msk [vmem:[%s5299_s2 + $0x440] sm:$0xff] %vm2447_vm0, %v2409_v5  ;;  %v2412_v8 = vmul.f32 %v2101_v6, %v1368_v4  ;;  %v1390_v6 = vld [vmem:[%s5298_s1 + $0x508] sm:$0xff] }
 0x1b1   :  { %v2096_v9 = vpop.permute.xlu0 %2095 }
 0x1b2   :  { %2587 = vst.msk [vmem:[%s5299_s2 + $0x458] sm:$0xff] %vm2447_vm0, %v2412_v8  ;;  %v2411_v11 = vmul.f32 %v2096_v9, %v1367_v7  ;;  %v1389_v9 = vld [vmem:[%s5298_s1 + $0x500] sm:$0xff] }
 0x1b3   :  { %v2111_v12 = vpop.permute.xlu1 %2110 }
 0x1b4   :  { %2586 = vst.msk [vmem:[%s5299_s2 + $0x450] sm:$0xff] %vm2447_vm0, %v2411_v11  ;;  %v2414_v14 = vmul.f32 %v2111_v12, %v1370_v10  ;;  %v1392_v12 = vld [vmem:[%s5298_s1 + $0x518] sm:$0xff] }
 0x1b5   :  { %v2106_v15 = vpop.permute.xlu0 %2105 }
 0x1b6   :  { %2589 = vst.msk [vmem:[%s5299_s2 + $0x468] sm:$0xff] %vm2447_vm0, %v2414_v14  ;;  %v2413_v17 = vmul.f32 %v2106_v15, %v1369_v13  ;;  %v1391_v15 = vld [vmem:[%s5298_s1 + $0x510] sm:$0xff] }
 0x1b7   :  { %v2121_v18 = vpop.permute.xlu1 %2120 }
 0x1b8   :  { %2588 = vst.msk [vmem:[%s5299_s2 + $0x460] sm:$0xff] %vm2447_vm0, %v2413_v17  ;;  %v2416_v20 = vmul.f32 %v2121_v18, %v1372_v16  ;;  %v1394_v18 = vld [vmem:[%s5298_s1 + $0x528] sm:$0xff] }
 0x1b9   :  { %v2116_v21 = vpop.permute.xlu0 %2115 }
 0x1ba   :  { %2591 = vst.msk [vmem:[%s5299_s2 + $0x478] sm:$0xff] %vm2447_vm0, %v2416_v20  ;;  %v2415_v23 = vmul.f32 %v2116_v21, %v1371_v19  ;;  %v1393_v21 = vld [vmem:[%s5298_s1 + $0x520] sm:$0xff] }
 0x1bb   :  { %v2131_v24 = vpop.permute.xlu1 %2130 }
 0x1bc   :  { %2590 = vst.msk [vmem:[%s5299_s2 + $0x470] sm:$0xff] %vm2447_vm0, %v2415_v23  ;;  %v2418_v26 = vmul.f32 %v2131_v24, %v1374_v22  ;;  %v1396_v24 = vld [vmem:[%s5298_s1 + $0x538] sm:$0xff] }
 0x1bd   :  { %v2126_v27 = vpop.permute.xlu0 %2125 }
 0x1be   :  { %2593 = vst.msk [vmem:[%s5299_s2 + $0x488] sm:$0xff] %vm2447_vm0, %v2418_v26  ;;  %v2417_v29 = vmul.f32 %v2126_v27, %v1373_v25  ;;  %v1395_v27 = vld [vmem:[%s5298_s1 + $0x530] sm:$0xff] }
 0x1bf   :  { %v2141_v30 = vpop.permute.xlu1 %2140 }
 0x1c0   :  { %2592 = vst.msk [vmem:[%s5299_s2 + $0x480] sm:$0xff] %vm2447_vm0, %v2417_v29  ;;  %v2420_v32 = vmul.f32 %v2141_v30, %v1376_v28  ;;  %v1398_v30 = vld [vmem:[%s5298_s1 + $0x548] sm:$0xff] }
 0x1c1   :  { %v2136_v33 = vpop.permute.xlu0 %2135 }
 0x1c2   :  { %2595 = vst.msk [vmem:[%s5299_s2 + $0x498] sm:$0xff] %vm2447_vm0, %v2420_v32  ;;  %v2419_v35 = vmul.f32 %v2136_v33, %v1375_v31  ;;  %v1397_v33 = vld [vmem:[%s5298_s1 + $0x540] sm:$0xff] }
 0x1c3   :  { %v2151_v36 = vpop.permute.xlu1 %2150 }
 0x1c4   :  { %2594 = vst.msk [vmem:[%s5299_s2 + $0x490] sm:$0xff] %vm2447_vm0, %v2419_v35  ;;  %v2422_v38 = vmul.f32 %v2151_v36, %v1378_v34  ;;  %v1400_v36 = vld [vmem:[%s5298_s1 + $0x558] sm:$0xff] }
 0x1c5   :  { %v2146_v39 = vpop.permute.xlu0 %2145 }
 0x1c6   :  { %2597 = vst.msk [vmem:[%s5299_s2 + $0x4a8] sm:$0xff] %vm2447_vm0, %v2422_v38  ;;  %v2421_v41 = vmul.f32 %v2146_v39, %v1377_v37  ;;  %v1399_v39 = vld [vmem:[%s5298_s1 + $0x550] sm:$0xff] }
 0x1c7   :  { %v2161_v42 = vpop.permute.xlu1 %2160 }
 0x1c8   :  { %2596 = vst.msk [vmem:[%s5299_s2 + $0x4a0] sm:$0xff] %vm2447_vm0, %v2421_v41  ;;  %v2424_v44 = vmul.f32 %v2161_v42, %v1380_v40  ;;  %v1402_v42 = vld [vmem:[%s5298_s1 + $0x568] sm:$0xff] }
 0x1c9   :  { %v2156_v45 = vpop.permute.xlu0 %2155 }
 0x1ca   :  { %2599 = vst.msk [vmem:[%s5299_s2 + $0x4b8] sm:$0xff] %vm2447_vm0, %v2424_v44  ;;  %v2423_v47 = vmul.f32 %v2156_v45, %v1379_v43  ;;  %v1401_v45 = vld [vmem:[%s5298_s1 + $0x560] sm:$0xff] }
 0x1cb   :  { %v2171_v48 = vpop.permute.xlu1 %2170 }
 0x1cc   :  { %2598 = vst.msk [vmem:[%s5299_s2 + $0x4b0] sm:$0xff] %vm2447_vm0, %v2423_v47  ;;  %v2426_v50 = vmul.f32 %v2171_v48, %v1382_v46 }
 0x1cd   :  { %v2166_v51 = vpop.permute.xlu0 %2165 }
 0x1ce   :  { %2601 = vst.msk [vmem:[%s5299_s2 + $0x4c8] sm:$0xff] %vm2447_vm0, %v2426_v50  ;;  %v2425_v53 = vmul.f32 %v2166_v51, %v1381_v49 }
 0x1cf   :  { %v2181_v54 = vpop.permute.xlu1 %2180 }
 0x1d0   :  { %2600 = vst.msk [vmem:[%s5299_s2 + $0x4c0] sm:$0xff] %vm2447_vm0, %v2425_v53  ;;  %v2428_v56 = vmul.f32 %v2181_v54, %v1384_v52 }
 0x1d1   :  { %v2176_v57 = vpop.permute.xlu0 %2175 }
 0x1d2   :  { %2603 = vst.msk [vmem:[%s5299_s2 + $0x4d8] sm:$0xff] %vm2447_vm0, %v2428_v56  ;;  %v2427_v59 = vmul.f32 %v2176_v57, %v1383_v55 }
 0x1d3   :  { %v2191_v60 = vpop.permute.xlu1 %2190 }
 0x1d4   :  { %2602 = vst.msk [vmem:[%s5299_s2 + $0x4d0] sm:$0xff] %vm2447_vm0, %v2427_v59  ;;  %v2430_v62 = vmul.f32 %v2191_v60, %v1386_v58 }
 0x1d5   :  { %v2186_v63 = vpop.permute.xlu0 %2185 }
 0x1d6   :  { %2605 = vst.msk [vmem:[%s5299_s2 + $0x4e8] sm:$0xff] %vm2447_vm0, %v2430_v62  ;;  %v2429_v1 = vmul.f32 %v2186_v63, %v1385_v61 }
 0x1d7   :  { %v2201_v2 = vpop.permute.xlu1 %2200 }
 0x1d8   :  { %2604 = vst.msk [vmem:[%s5299_s2 + $0x4e0] sm:$0xff] %vm2447_vm0, %v2429_v1  ;;  %v2432_v4 = vmul.f32 %v2201_v2, %v1388_v0 }
 0x1d9   :  { %v2196_v5 = vpop.permute.xlu0 %2195 }
 0x1da   :  { %2607 = vst.msk [vmem:[%s5299_s2 + $0x4f8] sm:$0xff] %vm2447_vm0, %v2432_v4  ;;  %v2431_v7 = vmul.f32 %v2196_v5, %v1387_v3 }
 0x1db   :  { %v2211_v8 = vpop.permute.xlu1 %2210 }
 0x1dc   :  { %2606 = vst.msk [vmem:[%s5299_s2 + $0x4f0] sm:$0xff] %vm2447_vm0, %v2431_v7  ;;  %v2434_v10 = vmul.f32 %v2211_v8, %v1390_v6 }
 0x1dd   :  { %v2206_v11 = vpop.permute.xlu0 %2205 }
 0x1de   :  { %2609 = vst.msk [vmem:[%s5299_s2 + $0x508] sm:$0xff] %vm2447_vm0, %v2434_v10  ;;  %v2433_v13 = vmul.f32 %v2206_v11, %v1389_v9 }
 0x1df   :  { %v2221_v14 = vpop.permute.xlu1 %2220 }
 0x1e0   :  { %2608 = vst.msk [vmem:[%s5299_s2 + $0x500] sm:$0xff] %vm2447_vm0, %v2433_v13  ;;  %v2436_v16 = vmul.f32 %v2221_v14, %v1392_v12 }
 0x1e1   :  { %v2216_v17 = vpop.permute.xlu0 %2215 }
 0x1e2   :  { %2611 = vst.msk [vmem:[%s5299_s2 + $0x518] sm:$0xff] %vm2447_vm0, %v2436_v16  ;;  %v2435_v19 = vmul.f32 %v2216_v17, %v1391_v15 }
 0x1e3   :  { %v2231_v20 = vpop.permute.xlu1 %2230 }
 0x1e4   :  { %2610 = vst.msk [vmem:[%s5299_s2 + $0x510] sm:$0xff] %vm2447_vm0, %v2435_v19  ;;  %v2438_v22 = vmul.f32 %v2231_v20, %v1394_v18 }
 0x1e5   :  { %v2226_v23 = vpop.permute.xlu0 %2225 }
 0x1e6   :  { %2613 = vst.msk [vmem:[%s5299_s2 + $0x528] sm:$0xff] %vm2447_vm0, %v2438_v22  ;;  %v2437_v25 = vmul.f32 %v2226_v23, %v1393_v21 }
 0x1e7   :  { %v2241_v26 = vpop.permute.xlu1 %2240 }
 0x1e8   :  { %2612 = vst.msk [vmem:[%s5299_s2 + $0x520] sm:$0xff] %vm2447_vm0, %v2437_v25  ;;  %v2440_v28 = vmul.f32 %v2241_v26, %v1396_v24 }
 0x1e9   :  { %v2236_v29 = vpop.permute.xlu0 %2235 }
 0x1ea   :  { %2615 = vst.msk [vmem:[%s5299_s2 + $0x538] sm:$0xff] %vm2447_vm0, %v2440_v28  ;;  %v2439_v31 = vmul.f32 %v2236_v29, %v1395_v27 }
 0x1eb   :  { %v2251_v32 = vpop.permute.xlu1 %2250 }
 0x1ec   :  { %2614 = vst.msk [vmem:[%s5299_s2 + $0x530] sm:$0xff] %vm2447_vm0, %v2439_v31  ;;  %v2442_v34 = vmul.f32 %v2251_v32, %v1398_v30 }
 0x1ed   :  { %v2246_v35 = vpop.permute.xlu0 %2245 }
 0x1ee   :  { %2617 = vst.msk [vmem:[%s5299_s2 + $0x548] sm:$0xff] %vm2447_vm0, %v2442_v34  ;;  %v2441_v37 = vmul.f32 %v2246_v35, %v1397_v33 }
 0x1ef   :  { %v2261_v38 = vpop.permute.xlu1 %2260 }
 0x1f0   :  { %2616 = vst.msk [vmem:[%s5299_s2 + $0x540] sm:$0xff] %vm2447_vm0, %v2441_v37  ;;  %v2444_v40 = vmul.f32 %v2261_v38, %v1400_v36 }
 0x1f1   :  { %v2256_v41 = vpop.permute.xlu0 %2255 }
 0x1f2   :  { %2619 = vst.msk [vmem:[%s5299_s2 + $0x558] sm:$0xff] %vm2447_vm0, %v2444_v40  ;;  %v2443_v43 = vmul.f32 %v2256_v41, %v1399_v39 }
 0x1f3   :  { %v2271_v44 = vpop.permute.xlu1 %2270 }
 0x1f4   :  { %2618 = vst.msk [vmem:[%s5299_s2 + $0x550] sm:$0xff] %vm2447_vm0, %v2443_v43  ;;  %v2446_v46 = vmul.f32 %v2271_v44, %v1402_v42 }
 0x1f5   :  { %v2266_v47 = vpop.permute.xlu0 %2265 }
 0x1f6   :  { %2621 = vst.msk [vmem:[%s5299_s2 + $0x568] sm:$0xff] %vm2447_vm0, %v2446_v46  ;;  %v2445_v48 = vmul.f32 %v2266_v47, %v1401_v45 }
 0x1f8   :  { %2620 = vst.msk [vmem:[%s5299_s2 + $0x560] sm:$0xff] %vm2447_vm0, %v2445_v48 }

</bundles_post_ra>
